<compile_context>
chip_gen: v6e
topology: v6e:2x2x1
jax: 0.10.0
libtpu: 0.0.40
codegen_flags: <defaults>
</compile_context>

<pallas_src>
import functools
import numpy as np
import jax
import jax.numpy as jnp
from jax import lax
from jax.experimental import pallas as pl
from jax.experimental.pallas import tpu as pltpu


def _attn_prop_kernel(x_ref, k_ref, v_ref,
                      wq_ref, bq_ref,
                      wm_ref, bm_ref,
                      w1a_ref, w1b_ref, b1_ref,
                      w2_ref, b2_ref,
                      o_ref, *, num_heads, exp_dtype):
    f32 = jnp.float32
    bf16 = jnp.bfloat16
    contract_last = (((1,), (1,)), ((), ()))   # contract last dim of both, no batch dims

    x = x_ref[...]                 # (TN, D) bf16  query-token tile
    tn, d = x.shape

    # Per-head attention; the merge 1x1 conv is folded into the loop as (dm, D)
    # row blocks of Wmerge^T accumulated into `message`, so the head-major
    # (TN, D) "attn" tensor never materializes.  K/V were precomputed per batch
    # outside the grid (no re-projection per N tile).
    message = jnp.zeros((tn, d), f32)
    for h in range(num_heads):     # static unroll (few heads)
        # 1/sqrt(dm) softmax scale already folded into wq/bq.
        qh = (jnp.dot(x, wq_ref[h], preferred_element_type=f32)
              + bq_ref[h]).astype(bf16)                                   # (TN, dm)
        kh = k_ref[h]                                                     # (M, dm) bf16
        vh = v_ref[h]                                                     # (M, dm) bf16

        # QK^T without materializing kh.T: the MXU contracts the last dims.
        scores = lax.dot_general(qh, kh, dimension_numbers=contract_last,
                                 preferred_element_type=f32)              # (TN, M)
        scores = scores - jnp.max(scores, axis=-1, keepdims=True)
        p = jnp.exp(scores.astype(exp_dtype))      # bf16 exp on v6e/v7x (bf16 EUP)
        denom = jnp.sum(p.astype(f32), axis=-1, keepdims=True)            # (TN, 1)
        oh = jnp.dot(p.astype(bf16), vh, preferred_element_type=f32)      # (TN, dm)
        # Deferred softmax normalization on the narrow (TN, dm) output; the
        # approximate reciprocal runs on the EUP slot.
        oh = oh * pl.reciprocal(denom, approx=True)
        # Merge conv, head-h row block: accumulate straight into `message`.
        message = message + jnp.dot(oh.astype(bf16), wm_ref[h],
                                    preferred_element_type=f32)
    message = message + bm_ref[...]                                       # (TN, D) f32

    # MLP on concat([x, message]) without the lane-dim concatenate: W1^T split
    # into the row blocks acting on x and on message.  Eval-mode BatchNorm is
    # already folded into w1a/w1b/b1.
    h1 = (jnp.dot(x, w1a_ref[...], preferred_element_type=f32)
          + jnp.dot(message.astype(bf16), w1b_ref[...], preferred_element_type=f32)
          + b1_ref[...])                                                  # (TN, 2D)
    h1 = jnp.maximum(h1, 0.0).astype(bf16)                                # ReLU
    o_ref[...] = (jnp.dot(h1, w2_ref[...], preferred_element_type=f32)
                  + b2_ref[...]).astype(o_ref.dtype)


def _device_kind():
    try:
        return jax.devices()[0].device_kind.lower()
    except Exception:
        return ""


def attentional_propagation_nwc(x_nwd, src_nwd, params, num_heads, *,
                                n_tile=256, out_dtype=jnp.bfloat16):
    """x_nwd: (B, N, D), src_nwd: (B, M, D) -> (B, N, D) in out_dtype."""
    B, N, D = x_nwd.shape
    M = src_nwd.shape[1]
    assert D % num_heads == 0
    dm = D // num_heads
    D2 = 2 * D
    bf16, f32 = jnp.bfloat16, jnp.float32

    TN = N if N <= n_tile else n_tile
    assert N % TN == 0  # TODO(synk): ragged N tiles not handled
    # v7x has 2 TensorCores: expose >= 2 parallel programs when possible.
    if B * (N // TN) < 2:
        for cand in (TN // 2, TN // 4):
            if cand >= 8 and cand % 8 == 0 and N % cand == 0:
                TN = cand
                break
    n_tiles = N // TN

    kind = _device_kind()
    # bf16 EUP exists on v6e/v7x; keep f32 exp elsewhere (v5e has no bf16 EUP).
    exp_dtype = bf16 if ("v6" in kind or "v7" in kind) else f32
    if "v7" in kind:
        vmem_limit = 48 * 1024 * 1024      # 64 MiB physical: leave headroom
    elif "v5" in kind or "v6" in kind:
        vmem_limit = 96 * 1024 * 1024      # 128 MiB physical parts
    else:
        vmem_limit = None                  # unknown chip: leave compiler default

    x = x_nwd.astype(bf16)
    s = src_nwd.astype(bf16)

    # PyTorch splits channels as .view(B, dm, H, N) -> channel c = d*H + h.
    # Head-major permutation c' = h*dm + d makes each head contiguous.
    perm = jnp.arange(D).reshape(dm, num_heads).T.reshape(-1)
    scale = 1.0 / (dm ** 0.5)

    def proj_headmajor(w, b, fold_scale=False):
        w = w.astype(f32)
        b = b.astype(f32)
        if fold_scale:                       # fold softmax 1/sqrt(dm) into the projection
            w = w * scale
            b = b * scale
        wt = w[perm].T                                            # (D_in, D_out head-major)
        w_h = wt.reshape(D, num_heads, dm).transpose(1, 0, 2)     # (H, D, dm)
        b_h = b[perm].reshape(num_heads, 1, dm)
        return w_h, b_h

    wq_h, bq_h = proj_headmajor(params["wq"], params["bq"], fold_scale=True)
    wk_h, bk_h = proj_headmajor(params["wk"], params["bk"])
    wv_h, bv_h = proj_headmajor(params["wv"], params["bv"])
    wq_h = wq_h.astype(bf16)

    # Hoist the source-side K/V projections out of the (b, n) grid: one XLA
    # matmul per batch instead of a recompute for every N tile.
    k_bh = (jnp.einsum('bmd,hde->bhme', s, wk_h.astype(bf16),
                       preferred_element_type=f32) + bk_h[None]).astype(bf16)  # (B,H,M,dm)
    v_bh = (jnp.einsum('bmd,hde->bhme', s, wv_h.astype(bf16),
                       preferred_element_type=f32) + bv_h[None]).astype(bf16)  # (B,H,M,dm)

    # Merge conv: permute its INPUT channels to head-major, then split into
    # per-head (dm, D) row blocks of Wmerge^T.
    wm_h = params["wm"].astype(f32)[:, perm].T.reshape(num_heads, dm, D).astype(bf16)
    bm = params["bm"].astype(f32)[None, :]

    # MLP first conv: split into the block acting on x and the block acting on
    # message, with eval-mode BatchNorm folded in (f32 fold, then bf16 cast).
    eps = 1e-5
    bn_scale = params["bn_gamma"].astype(f32) / jnp.sqrt(params["bn_var"].astype(f32) + eps)
    bn_shift = params["bn_beta"].astype(f32) - params["bn_mean"].astype(f32) * bn_scale
    w1 = params["w1"].astype(f32)
    w1a = (w1[:, :D].T * bn_scale[None, :]).astype(bf16)       # (D, 2D)
    w1b = (w1[:, D:].T * bn_scale[None, :]).astype(bf16)       # (D, 2D)
    b1 = (params["b1"].astype(f32) * bn_scale + bn_shift)[None, :]   # (1, 2D) f32
    w2t = params["w2"].astype(f32).T.astype(bf16)               # (2D, D)
    b2 = params["b2"].astype(f32)[None, :]

    kern = functools.partial(_attn_prop_kernel, num_heads=num_heads,
                             exp_dtype=exp_dtype)

    def run(single_buffer_consts):
        def rep(shape):  # grid-invariant (replicated) operand
            nd = len(shape)
            idx = lambda b, n: (0,) * nd
            if single_buffer_consts:
                # Constant index map -> single buffer: returns VMEM, no useless
                # pipeline bookkeeping.
                return pl.BlockSpec(shape, idx, pipeline_mode=pl.Buffered(1))
            return pl.BlockSpec(shape, idx)

        in_specs = [
            pl.BlockSpec((None, TN, D), lambda b, n: (b, n, 0)),                 # x tile
            pl.BlockSpec((None, num_heads, M, dm), lambda b, n: (b, 0, 0, 0)),   # K (per batch)
            pl.BlockSpec((None, num_heads, M, dm), lambda b, n: (b, 0, 0, 0)),   # V (per batch)
            rep((num_heads, D, dm)), rep((num_heads, 1, dm)),                    # Wq (scaled), bq
            rep((num_heads, dm, D)), rep((1, D)),                                # Wmerge blocks, bmerge
            rep((D, D2)), rep((D, D2)), rep((1, D2)),                            # W1a', W1b', b1'
            rep((D2, D)), rep((1, D)),                                           # W2^T, b2
        ]
        return pl.pallas_call(
            kern,
            out_shape=jax.ShapeDtypeStruct((B, N, D), out_dtype),
            grid=(B, n_tiles),
            in_specs=in_specs,
            out_specs=pl.BlockSpec((None, TN, D), lambda b, n: (b, n, 0)),
            compiler_params=pltpu.CompilerParams(
                dimension_semantics=("parallel", "parallel"),
                vmem_limit_bytes=vmem_limit,
            ),
        )(x, k_bh, v_bh, wq_h, bq_h, wm_h, bm, w1a, w1b, b1, w2t, b2)

    try:
        return run(True)
    except Exception:
        # pl.Buffered(1) not supported by this jax/runtime -> default buffering.
        return run(False)


def attentional_propagation(x_ncw, src_ncw, params, num_heads, *,
                            n_tile=256, out_dtype=jnp.bfloat16):
    """PyTorch NCW interface: x_ncw (B, D, N), src_ncw (B, D, M) -> (B, D, N).
    Stacked layers should call attentional_propagation_nwc directly and
    transpose once at model entry/exit instead of per layer."""
    x = jnp.transpose(x_ncw, (0, 2, 1))
    s = jnp.transpose(src_ncw, (0, 2, 1))
    out = attentional_propagation_nwc(x, s, params, num_heads,
                                      n_tile=n_tile, out_dtype=out_dtype)
    return jnp.transpose(out, (0, 2, 1))   # back to PyTorch NCW


def make_params(key, D):
    """Deterministic synthetic parameters matching the module's __init__ shapes
    (PyTorch Conv1d weight convention: (out_channels, in_channels))."""
    D2 = 2 * D
    keys = jax.random.split(key, 16)

    def w(k, shape, scale=0.1):
        return (scale * jax.random.normal(k, shape)).astype(jnp.float32)

    return dict(
        wq=w(keys[0], (D, D)), bq=w(keys[1], (D,)),
        wk=w(keys[2], (D, D)), bk=w(keys[3], (D,)),
        wv=w(keys[4], (D, D)), bv=w(keys[5], (D,)),
        wm=w(keys[6], (D, D)), bm=w(keys[7], (D,)),
        w1=w(keys[8], (D2, D2)), b1=w(keys[9], (D2,)),
        bn_gamma=(1.0 + 0.1 * jax.random.normal(keys[10], (D2,))).astype(jnp.float32),
        bn_beta=w(keys[11], (D2,)),
        bn_mean=w(keys[12], (D2,)),
        bn_var=(1.0 + 0.1 * jax.random.normal(keys[13], (D2,)) ** 2).astype(jnp.float32),
        w2=w(keys[14], (D, D2)),           # Conv1d(2D -> D): weight (D, 2D)
        b2=jnp.zeros((D,), jnp.float32),   # nn.init.constant_(mlp[-1].bias, 0.0)
    )


def reference(x, src, p, num_heads):
    """Pure-JAX f32 mirror of the PyTorch forward (NCW layout, original channel order)."""
    B, D, N = x.shape
    dm = D // num_heads

    def conv(wt, b, t):   # Conv1d kernel_size=1, weight (out, in)
        return jnp.einsum('oc,bcn->bon', wt, t) + b[None, :, None]

    q = conv(p['wq'], p['bq'], x).reshape(B, dm, num_heads, N)
    k = conv(p['wk'], p['bk'], src).reshape(B, dm, num_heads, -1)
    v = conv(p['wv'], p['bv'], src).reshape(B, dm, num_heads, -1)
    scores = jnp.einsum('bdhn,bdhm->bhnm', q, k) / (dm ** 0.5)
    prob = jax.nn.softmax(scores, axis=-1)
    o = jnp.einsum('bhnm,bdhm->bdhn', prob, v).reshape(B, D, N)
    message = conv(p['wm'], p['bm'], o)
    cat = jnp.concatenate([x, message], axis=1)
    h1 = conv(p['w1'], p['b1'], cat)
    h1 = (h1 - p['bn_mean'][None, :, None]) / jnp.sqrt(p['bn_var'][None, :, None] + 1e-5)
    h1 = h1 * p['bn_gamma'][None, :, None] + p['bn_beta'][None, :, None]
    h1 = jnp.maximum(h1, 0.0)
    return conv(p['w2'], p['b2'], h1)


if __name__ == "__main__":
    D, H = 32, 4          # feature_dim, num_heads
    B, N, M = 2, 16, 8    # batch, query tokens, source tokens

    key = jax.random.PRNGKey(0)
    kx, ks, kp = jax.random.split(key, 3)
    x = jax.random.normal(kx, (B, D, N), jnp.float32)     # PyTorch NCW
    src = jax.random.normal(ks, (B, D, M), jnp.float32)
    params = make_params(kp, D)

    out = attentional_propagation(x, src, params, H)
    out = jax.block_until_ready(out)

    ref = reference(x, src, params, H)
    # bf16 activations/weights/output with f32 MXU accumulation -> bf16-level tolerance.
    out_f32 = np.asarray(out.astype(jnp.float32))
    np.testing.assert_allclose(out_f32, np.asarray(ref), rtol=2e-2, atol=2e-2)
    print("KERNEL_OK")
</pallas_src>

<mosaic_0001>
module attributes {stable_mosaic.version = 11 : i64} {
  func.func @_attn_prop_kernel(%arg0: i32, %arg1: i32, %arg2: memref<1x16x32xbf16, #tpu.memory_space<vmem>>, %arg3: memref<1x4x8x8xbf16, #tpu.memory_space<vmem>>, %arg4: memref<1x4x8x8xbf16, #tpu.memory_space<vmem>>, %arg5: memref<4x32x8xbf16, #tpu.memory_space<vmem>>, %arg6: memref<4x1x8xf32, #tpu.memory_space<vmem>>, %arg7: memref<4x8x32xbf16, #tpu.memory_space<vmem>>, %arg8: memref<1x32xf32, #tpu.memory_space<vmem>>, %arg9: memref<32x64xbf16, #tpu.memory_space<vmem>>, %arg10: memref<32x64xbf16, #tpu.memory_space<vmem>>, %arg11: memref<1x64xf32, #tpu.memory_space<vmem>>, %arg12: memref<64x32xbf16, #tpu.memory_space<vmem>>, %arg13: memref<1x32xf32, #tpu.memory_space<vmem>>, %arg14: memref<1x16x32xbf16, #tpu.memory_space<vmem>>) attributes {dimension_semantics = [#tpu.dimension_semantics<parallel>, #tpu.dimension_semantics<parallel>], iteration_bounds = array<i64: 2, 1>, scalar_prefetch = 0 : i64, scratch_operands = 0 : i64, tpu.core_type = #tpu.core_type<tc>, window_params = [{transform_indices = @transform_0, window_bounds = array<i64: 1, 16, 32>}, {transform_indices = @transform_1, window_bounds = array<i64: 1, 4, 8, 8>}, {transform_indices = @transform_2, window_bounds = array<i64: 1, 4, 8, 8>}, {pipeline_mode = #tpu.pipeline_mode<synchronous>, transform_indices = @transform_3, window_bounds = array<i64: 4, 32, 8>}, {pipeline_mode = #tpu.pipeline_mode<synchronous>, transform_indices = @transform_4, window_bounds = array<i64: 4, 1, 8>}, {pipeline_mode = #tpu.pipeline_mode<synchronous>, transform_indices = @transform_5, window_bounds = array<i64: 4, 8, 32>}, {pipeline_mode = #tpu.pipeline_mode<synchronous>, transform_indices = @transform_6, window_bounds = array<i64: 1, 32>}, {pipeline_mode = #tpu.pipeline_mode<synchronous>, transform_indices = @transform_7, window_bounds = array<i64: 32, 64>}, {pipeline_mode = #tpu.pipeline_mode<synchronous>, transform_indices = @transform_8, window_bounds = array<i64: 32, 64>}, {pipeline_mode = #tpu.pipeline_mode<synchronous>, transform_indices = @transform_9, window_bounds = array<i64: 1, 64>}, {pipeline_mode = #tpu.pipeline_mode<synchronous>, transform_indices = @transform_10, window_bounds = array<i64: 64, 32>}, {pipeline_mode = #tpu.pipeline_mode<synchronous>, transform_indices = @transform_11, window_bounds = array<i64: 1, 32>}, {transform_indices = @transform_12, window_bounds = array<i64: 1, 16, 32>}]} {
    %c0 = arith.constant 0 : index
    %c0_0 = arith.constant 0 : index
    %c0_1 = arith.constant 0 : index
    %0 = vector.load %arg2[%c0, %c0_0, %c0_1] : memref<1x16x32xbf16, #tpu.memory_space<vmem>>, vector<1x16x32xbf16>
    %1 = vector.shape_cast %0 : vector<1x16x32xbf16> to vector<16x32xbf16>
    %cst = arith.constant 0.000000e+00 : f32
    %2 = vector.broadcast %cst : f32 to vector<16x32xf32>
    %c0_2 = arith.constant 0 : index
    %c0_3 = arith.constant 0 : index
    %c0_4 = arith.constant 0 : index
    %3 = vector.load %arg5[%c0_2, %c0_3, %c0_4] : memref<4x32x8xbf16, #tpu.memory_space<vmem>>, vector<1x32x8xbf16>
    %4 = vector.shape_cast %3 : vector<1x32x8xbf16> to vector<32x8xbf16>
    %cst_5 = arith.constant dense<0.000000e+00> : vector<16x8xf32>
    %5 = tpu.matmul %1, %4, %cst_5 {dimension_numbers = #tpu.dot_dimension_numbers<[1], [0], [0], [1], [0, 0, 1, 1], [], []>} : vector<16x32xbf16>, vector<32x8xbf16>, vector<16x8xf32> -> vector<16x8xf32>
    %c0_6 = arith.constant 0 : index
    %c0_7 = arith.constant 0 : index
    %c0_8 = arith.constant 0 : index
    %6 = vector.load %arg6[%c0_6, %c0_7, %c0_8] : memref<4x1x8xf32, #tpu.memory_space<vmem>>, vector<1x1x8xf32>
    %7 = vector.shape_cast %6 : vector<1x1x8xf32> to vector<1x8xf32>
    %8 = vector.broadcast %7 : vector<1x8xf32> to vector<16x8xf32>
    %9 = arith.addf %5, %8 : vector<16x8xf32>
    %10 = arith.truncf %9 : vector<16x8xf32> to vector<16x8xbf16>
    %c0_9 = arith.constant 0 : index
    %c0_10 = arith.constant 0 : index
    %c0_11 = arith.constant 0 : index
    %c0_12 = arith.constant 0 : index
    %11 = vector.load %arg3[%c0_9, %c0_10, %c0_11, %c0_12] : memref<1x4x8x8xbf16, #tpu.memory_space<vmem>>, vector<1x1x8x8xbf16>
    %12 = vector.shape_cast %11 : vector<1x1x8x8xbf16> to vector<8x8xbf16>
    %c0_13 = arith.constant 0 : index
    %c0_14 = arith.constant 0 : index
    %c0_15 = arith.constant 0 : index
    %c0_16 = arith.constant 0 : index
    %13 = vector.load %arg4[%c0_13, %c0_14, %c0_15, %c0_16] : memref<1x4x8x8xbf16, #tpu.memory_space<vmem>>, vector<1x1x8x8xbf16>
    %14 = vector.shape_cast %13 : vector<1x1x8x8xbf16> to vector<8x8xbf16>
    %cst_17 = arith.constant dense<0.000000e+00> : vector<16x8xf32>
    %15 = tpu.matmul %10, %12, %cst_17 {dimension_numbers = #tpu.dot_dimension_numbers<[1], [1], [0], [0], [0, 0, 1, 0], [], []>} : vector<16x8xbf16>, vector<8x8xbf16>, vector<16x8xf32> -> vector<16x8xf32>
    %cst_18 = arith.constant dense<0xFF800000> : vector<16xf32>
    %16 = vector.multi_reduction <maximumf>, %15, %cst_18 [1] : vector<16x8xf32> to vector<16xf32>
    %17 = vector.shape_cast %16 : vector<16xf32> to vector<16x1xf32>
    %18 = vector.broadcast %17 : vector<16x1xf32> to vector<16x8xf32>
    %19 = arith.subf %15, %18 : vector<16x8xf32>
    %20 = math.exp %19 : vector<16x8xf32>
    %cst_19 = arith.constant dense<0.000000e+00> : vector<16xf32>
    %21 = vector.multi_reduction <add>, %20, %cst_19 [1] : vector<16x8xf32> to vector<16xf32>
    %22 = vector.shape_cast %21 : vector<16xf32> to vector<16x1xf32>
    %23 = arith.truncf %20 : vector<16x8xf32> to vector<16x8xbf16>
    %cst_20 = arith.constant dense<0.000000e+00> : vector<16x8xf32>
    %24 = tpu.matmul %23, %14, %cst_20 {dimension_numbers = #tpu.dot_dimension_numbers<[1], [0], [0], [1], [0, 0, 1, 1], [], []>} : vector<16x8xbf16>, vector<8x8xbf16>, vector<16x8xf32> -> vector<16x8xf32>
    %25 = tpu.reciprocal %22 {approx = true} : vector<16x1xf32> -> vector<16x1xf32>
    %26 = vector.broadcast %25 : vector<16x1xf32> to vector<16x8xf32>
    %27 = arith.mulf %24, %26 : vector<16x8xf32>
    %28 = arith.truncf %27 : vector<16x8xf32> to vector<16x8xbf16>
    %c0_21 = arith.constant 0 : index
    %c0_22 = arith.constant 0 : index
    %c0_23 = arith.constant 0 : index
    %29 = vector.load %arg7[%c0_21, %c0_22, %c0_23] : memref<4x8x32xbf16, #tpu.memory_space<vmem>>, vector<1x8x32xbf16>
    %30 = vector.shape_cast %29 : vector<1x8x32xbf16> to vector<8x32xbf16>
    %cst_24 = arith.constant dense<0.000000e+00> : vector<16x32xf32>
    %31 = tpu.matmul %28, %30, %cst_24 {dimension_numbers = #tpu.dot_dimension_numbers<[1], [0], [0], [1], [0, 0, 1, 1], [], []>} : vector<16x8xbf16>, vector<8x32xbf16>, vector<16x32xf32> -> vector<16x32xf32>
    %32 = arith.addf %2, %31 : vector<16x32xf32>
    %c1 = arith.constant 1 : index
    %c0_25 = arith.constant 0 : index
    %c0_26 = arith.constant 0 : index
    %33 = vector.load %arg5[%c1, %c0_25, %c0_26] : memref<4x32x8xbf16, #tpu.memory_space<vmem>>, vector<1x32x8xbf16>
    %34 = vector.shape_cast %33 : vector<1x32x8xbf16> to vector<32x8xbf16>
    %cst_27 = arith.constant dense<0.000000e+00> : vector<16x8xf32>
    %35 = tpu.matmul %1, %34, %cst_27 {dimension_numbers = #tpu.dot_dimension_numbers<[1], [0], [0], [1], [0, 0, 1, 1], [], []>} : vector<16x32xbf16>, vector<32x8xbf16>, vector<16x8xf32> -> vector<16x8xf32>
    %c1_28 = arith.constant 1 : index
    %c0_29 = arith.constant 0 : index
    %c0_30 = arith.constant 0 : index
    %36 = vector.load %arg6[%c1_28, %c0_29, %c0_30] : memref<4x1x8xf32, #tpu.memory_space<vmem>>, vector<1x1x8xf32>
    %37 = vector.shape_cast %36 : vector<1x1x8xf32> to vector<1x8xf32>
    %38 = vector.broadcast %37 : vector<1x8xf32> to vector<16x8xf32>
    %39 = arith.addf %35, %38 : vector<16x8xf32>
    %40 = arith.truncf %39 : vector<16x8xf32> to vector<16x8xbf16>
    %c0_31 = arith.constant 0 : index
    %c1_32 = arith.constant 1 : index
    %c0_33 = arith.constant 0 : index
    %c0_34 = arith.constant 0 : index
    %41 = vector.load %arg3[%c0_31, %c1_32, %c0_33, %c0_34] : memref<1x4x8x8xbf16, #tpu.memory_space<vmem>>, vector<1x1x8x8xbf16>
    %42 = vector.shape_cast %41 : vector<1x1x8x8xbf16> to vector<8x8xbf16>
    %c0_35 = arith.constant 0 : index
    %c1_36 = arith.constant 1 : index
    %c0_37 = arith.constant 0 : index
    %c0_38 = arith.constant 0 : index
    %43 = vector.load %arg4[%c0_35, %c1_36, %c0_37, %c0_38] : memref<1x4x8x8xbf16, #tpu.memory_space<vmem>>, vector<1x1x8x8xbf16>
    %44 = vector.shape_cast %43 : vector<1x1x8x8xbf16> to vector<8x8xbf16>
    %cst_39 = arith.constant dense<0.000000e+00> : vector<16x8xf32>
    %45 = tpu.matmul %40, %42, %cst_39 {dimension_numbers = #tpu.dot_dimension_numbers<[1], [1], [0], [0], [0, 0, 1, 0], [], []>} : vector<16x8xbf16>, vector<8x8xbf16>, vector<16x8xf32> -> vector<16x8xf32>
    %cst_40 = arith.constant dense<0xFF800000> : vector<16xf32>
    %46 = vector.multi_reduction <maximumf>, %45, %cst_40 [1] : vector<16x8xf32> to vector<16xf32>
    %47 = vector.shape_cast %46 : vector<16xf32> to vector<16x1xf32>
    %48 = vector.broadcast %47 : vector<16x1xf32> to vector<16x8xf32>
    %49 = arith.subf %45, %48 : vector<16x8xf32>
    %50 = math.exp %49 : vector<16x8xf32>
    %cst_41 = arith.constant dense<0.000000e+00> : vector<16xf32>
    %51 = vector.multi_reduction <add>, %50, %cst_41 [1] : vector<16x8xf32> to vector<16xf32>
    %52 = vector.shape_cast %51 : vector<16xf32> to vector<16x1xf32>
    %53 = arith.truncf %50 : vector<16x8xf32> to vector<16x8xbf16>
    %cst_42 = arith.constant dense<0.000000e+00> : vector<16x8xf32>
    %54 = tpu.matmul %53, %44, %cst_42 {dimension_numbers = #tpu.dot_dimension_numbers<[1], [0], [0], [1], [0, 0, 1, 1], [], []>} : vector<16x8xbf16>, vector<8x8xbf16>, vector<16x8xf32> -> vector<16x8xf32>
    %55 = tpu.reciprocal %52 {approx = true} : vector<16x1xf32> -> vector<16x1xf32>
    %56 = vector.broadcast %55 : vector<16x1xf32> to vector<16x8xf32>
    %57 = arith.mulf %54, %56 : vector<16x8xf32>
    %58 = arith.truncf %57 : vector<16x8xf32> to vector<16x8xbf16>
    %c1_43 = arith.constant 1 : index
    %c0_44 = arith.constant 0 : index
    %c0_45 = arith.constant 0 : index
    %59 = vector.load %arg7[%c1_43, %c0_44, %c0_45] : memref<4x8x32xbf16, #tpu.memory_space<vmem>>, vector<1x8x32xbf16>
    %60 = vector.shape_cast %59 : vector<1x8x32xbf16> to vector<8x32xbf16>
    %cst_46 = arith.constant dense<0.000000e+00> : vector<16x32xf32>
    %61 = tpu.matmul %58, %60, %cst_46 {dimension_numbers = #tpu.dot_dimension_numbers<[1], [0], [0], [1], [0, 0, 1, 1], [], []>} : vector<16x8xbf16>, vector<8x32xbf16>, vector<16x32xf32> -> vector<16x32xf32>
    %62 = arith.addf %32, %61 : vector<16x32xf32>
    %c2 = arith.constant 2 : index
    %c0_47 = arith.constant 0 : index
    %c0_48 = arith.constant 0 : index
    %63 = vector.load %arg5[%c2, %c0_47, %c0_48] : memref<4x32x8xbf16, #tpu.memory_space<vmem>>, vector<1x32x8xbf16>
    %64 = vector.shape_cast %63 : vector<1x32x8xbf16> to vector<32x8xbf16>
    %cst_49 = arith.constant dense<0.000000e+00> : vector<16x8xf32>
    %65 = tpu.matmul %1, %64, %cst_49 {dimension_numbers = #tpu.dot_dimension_numbers<[1], [0], [0], [1], [0, 0, 1, 1], [], []>} : vector<16x32xbf16>, vector<32x8xbf16>, vector<16x8xf32> -> vector<16x8xf32>
    %c2_50 = arith.constant 2 : index
    %c0_51 = arith.constant 0 : index
    %c0_52 = arith.constant 0 : index
    %66 = vector.load %arg6[%c2_50, %c0_51, %c0_52] : memref<4x1x8xf32, #tpu.memory_space<vmem>>, vector<1x1x8xf32>
    %67 = vector.shape_cast %66 : vector<1x1x8xf32> to vector<1x8xf32>
    %68 = vector.broadcast %67 : vector<1x8xf32> to vector<16x8xf32>
    %69 = arith.addf %65, %68 : vector<16x8xf32>
    %70 = arith.truncf %69 : vector<16x8xf32> to vector<16x8xbf16>
    %c0_53 = arith.constant 0 : index
    %c2_54 = arith.constant 2 : index
    %c0_55 = arith.constant 0 : index
    %c0_56 = arith.constant 0 : index
    %71 = vector.load %arg3[%c0_53, %c2_54, %c0_55, %c0_56] : memref<1x4x8x8xbf16, #tpu.memory_space<vmem>>, vector<1x1x8x8xbf16>
    %72 = vector.shape_cast %71 : vector<1x1x8x8xbf16> to vector<8x8xbf16>
    %c0_57 = arith.constant 0 : index
    %c2_58 = arith.constant 2 : index
    %c0_59 = arith.constant 0 : index
    %c0_60 = arith.constant 0 : index
    %73 = vector.load %arg4[%c0_57, %c2_58, %c0_59, %c0_60] : memref<1x4x8x8xbf16, #tpu.memory_space<vmem>>, vector<1x1x8x8xbf16>
    %74 = vector.shape_cast %73 : vector<1x1x8x8xbf16> to vector<8x8xbf16>
    %cst_61 = arith.constant dense<0.000000e+00> : vector<16x8xf32>
    %75 = tpu.matmul %70, %72, %cst_61 {dimension_numbers = #tpu.dot_dimension_numbers<[1], [1], [0], [0], [0, 0, 1, 0], [], []>} : vector<16x8xbf16>, vector<8x8xbf16>, vector<16x8xf32> -> vector<16x8xf32>
    %cst_62 = arith.constant dense<0xFF800000> : vector<16xf32>
    %76 = vector.multi_reduction <maximumf>, %75, %cst_62 [1] : vector<16x8xf32> to vector<16xf32>
    %77 = vector.shape_cast %76 : vector<16xf32> to vector<16x1xf32>
    %78 = vector.broadcast %77 : vector<16x1xf32> to vector<16x8xf32>
    %79 = arith.subf %75, %78 : vector<16x8xf32>
    %80 = math.exp %79 : vector<16x8xf32>
    %cst_63 = arith.constant dense<0.000000e+00> : vector<16xf32>
    %81 = vector.multi_reduction <add>, %80, %cst_63 [1] : vector<16x8xf32> to vector<16xf32>
    %82 = vector.shape_cast %81 : vector<16xf32> to vector<16x1xf32>
    %83 = arith.truncf %80 : vector<16x8xf32> to vector<16x8xbf16>
    %cst_64 = arith.constant dense<0.000000e+00> : vector<16x8xf32>
    %84 = tpu.matmul %83, %74, %cst_64 {dimension_numbers = #tpu.dot_dimension_numbers<[1], [0], [0], [1], [0, 0, 1, 1], [], []>} : vector<16x8xbf16>, vector<8x8xbf16>, vector<16x8xf32> -> vector<16x8xf32>
    %85 = tpu.reciprocal %82 {approx = true} : vector<16x1xf32> -> vector<16x1xf32>
    %86 = vector.broadcast %85 : vector<16x1xf32> to vector<16x8xf32>
    %87 = arith.mulf %84, %86 : vector<16x8xf32>
    %88 = arith.truncf %87 : vector<16x8xf32> to vector<16x8xbf16>
    %c2_65 = arith.constant 2 : index
    %c0_66 = arith.constant 0 : index
    %c0_67 = arith.constant 0 : index
    %89 = vector.load %arg7[%c2_65, %c0_66, %c0_67] : memref<4x8x32xbf16, #tpu.memory_space<vmem>>, vector<1x8x32xbf16>
    %90 = vector.shape_cast %89 : vector<1x8x32xbf16> to vector<8x32xbf16>
    %cst_68 = arith.constant dense<0.000000e+00> : vector<16x32xf32>
    %91 = tpu.matmul %88, %90, %cst_68 {dimension_numbers = #tpu.dot_dimension_numbers<[1], [0], [0], [1], [0, 0, 1, 1], [], []>} : vector<16x8xbf16>, vector<8x32xbf16>, vector<16x32xf32> -> vector<16x32xf32>
    %92 = arith.addf %62, %91 : vector<16x32xf32>
    %c3 = arith.constant 3 : index
    %c0_69 = arith.constant 0 : index
    %c0_70 = arith.constant 0 : index
    %93 = vector.load %arg5[%c3, %c0_69, %c0_70] : memref<4x32x8xbf16, #tpu.memory_space<vmem>>, vector<1x32x8xbf16>
    %94 = vector.shape_cast %93 : vector<1x32x8xbf16> to vector<32x8xbf16>
    %cst_71 = arith.constant dense<0.000000e+00> : vector<16x8xf32>
    %95 = tpu.matmul %1, %94, %cst_71 {dimension_numbers = #tpu.dot_dimension_numbers<[1], [0], [0], [1], [0, 0, 1, 1], [], []>} : vector<16x32xbf16>, vector<32x8xbf16>, vector<16x8xf32> -> vector<16x8xf32>
    %c3_72 = arith.constant 3 : index
    %c0_73 = arith.constant 0 : index
    %c0_74 = arith.constant 0 : index
    %96 = vector.load %arg6[%c3_72, %c0_73, %c0_74] : memref<4x1x8xf32, #tpu.memory_space<vmem>>, vector<1x1x8xf32>
    %97 = vector.shape_cast %96 : vector<1x1x8xf32> to vector<1x8xf32>
    %98 = vector.broadcast %97 : vector<1x8xf32> to vector<16x8xf32>
    %99 = arith.addf %95, %98 : vector<16x8xf32>
    %100 = arith.truncf %99 : vector<16x8xf32> to vector<16x8xbf16>
    %c0_75 = arith.constant 0 : index
    %c3_76 = arith.constant 3 : index
    %c0_77 = arith.constant 0 : index
    %c0_78 = arith.constant 0 : index
    %101 = vector.load %arg3[%c0_75, %c3_76, %c0_77, %c0_78] : memref<1x4x8x8xbf16, #tpu.memory_space<vmem>>, vector<1x1x8x8xbf16>
    %102 = vector.shape_cast %101 : vector<1x1x8x8xbf16> to vector<8x8xbf16>
    %c0_79 = arith.constant 0 : index
    %c3_80 = arith.constant 3 : index
    %c0_81 = arith.constant 0 : index
    %c0_82 = arith.constant 0 : index
    %103 = vector.load %arg4[%c0_79, %c3_80, %c0_81, %c0_82] : memref<1x4x8x8xbf16, #tpu.memory_space<vmem>>, vector<1x1x8x8xbf16>
    %104 = vector.shape_cast %103 : vector<1x1x8x8xbf16> to vector<8x8xbf16>
    %cst_83 = arith.constant dense<0.000000e+00> : vector<16x8xf32>
    %105 = tpu.matmul %100, %102, %cst_83 {dimension_numbers = #tpu.dot_dimension_numbers<[1], [1], [0], [0], [0, 0, 1, 0], [], []>} : vector<16x8xbf16>, vector<8x8xbf16>, vector<16x8xf32> -> vector<16x8xf32>
    %cst_84 = arith.constant dense<0xFF800000> : vector<16xf32>
    %106 = vector.multi_reduction <maximumf>, %105, %cst_84 [1] : vector<16x8xf32> to vector<16xf32>
    %107 = vector.shape_cast %106 : vector<16xf32> to vector<16x1xf32>
    %108 = vector.broadcast %107 : vector<16x1xf32> to vector<16x8xf32>
    %109 = arith.subf %105, %108 : vector<16x8xf32>
    %110 = math.exp %109 : vector<16x8xf32>
    %cst_85 = arith.constant dense<0.000000e+00> : vector<16xf32>
    %111 = vector.multi_reduction <add>, %110, %cst_85 [1] : vector<16x8xf32> to vector<16xf32>
    %112 = vector.shape_cast %111 : vector<16xf32> to vector<16x1xf32>
    %113 = arith.truncf %110 : vector<16x8xf32> to vector<16x8xbf16>
    %cst_86 = arith.constant dense<0.000000e+00> : vector<16x8xf32>
    %114 = tpu.matmul %113, %104, %cst_86 {dimension_numbers = #tpu.dot_dimension_numbers<[1], [0], [0], [1], [0, 0, 1, 1], [], []>} : vector<16x8xbf16>, vector<8x8xbf16>, vector<16x8xf32> -> vector<16x8xf32>
    %115 = tpu.reciprocal %112 {approx = true} : vector<16x1xf32> -> vector<16x1xf32>
    %116 = vector.broadcast %115 : vector<16x1xf32> to vector<16x8xf32>
    %117 = arith.mulf %114, %116 : vector<16x8xf32>
    %118 = arith.truncf %117 : vector<16x8xf32> to vector<16x8xbf16>
    %c3_87 = arith.constant 3 : index
    %c0_88 = arith.constant 0 : index
    %c0_89 = arith.constant 0 : index
    %119 = vector.load %arg7[%c3_87, %c0_88, %c0_89] : memref<4x8x32xbf16, #tpu.memory_space<vmem>>, vector<1x8x32xbf16>
    %120 = vector.shape_cast %119 : vector<1x8x32xbf16> to vector<8x32xbf16>
    %cst_90 = arith.constant dense<0.000000e+00> : vector<16x32xf32>
    %121 = tpu.matmul %118, %120, %cst_90 {dimension_numbers = #tpu.dot_dimension_numbers<[1], [0], [0], [1], [0, 0, 1, 1], [], []>} : vector<16x8xbf16>, vector<8x32xbf16>, vector<16x32xf32> -> vector<16x32xf32>
    %122 = arith.addf %92, %121 : vector<16x32xf32>
    %c0_91 = arith.constant 0 : index
    %c0_92 = arith.constant 0 : index
    %123 = vector.load %arg8[%c0_91, %c0_92] : memref<1x32xf32, #tpu.memory_space<vmem>>, vector<1x32xf32>
    %124 = vector.broadcast %123 : vector<1x32xf32> to vector<16x32xf32>
    %125 = arith.addf %122, %124 : vector<16x32xf32>
    %c0_93 = arith.constant 0 : index
    %c0_94 = arith.constant 0 : index
    %126 = vector.load %arg9[%c0_93, %c0_94] : memref<32x64xbf16, #tpu.memory_space<vmem>>, vector<32x64xbf16>
    %cst_95 = arith.constant dense<0.000000e+00> : vector<16x64xf32>
    %127 = tpu.matmul %1, %126, %cst_95 {dimension_numbers = #tpu.dot_dimension_numbers<[1], [0], [0], [1], [0, 0, 1, 1], [], []>} : vector<16x32xbf16>, vector<32x64xbf16>, vector<16x64xf32> -> vector<16x64xf32>
    %128 = arith.truncf %125 : vector<16x32xf32> to vector<16x32xbf16>
    %c0_96 = arith.constant 0 : index
    %c0_97 = arith.constant 0 : index
    %129 = vector.load %arg10[%c0_96, %c0_97] : memref<32x64xbf16, #tpu.memory_space<vmem>>, vector<32x64xbf16>
    %cst_98 = arith.constant dense<0.000000e+00> : vector<16x64xf32>
    %130 = tpu.matmul %128, %129, %cst_98 {dimension_numbers = #tpu.dot_dimension_numbers<[1], [0], [0], [1], [0, 0, 1, 1], [], []>} : vector<16x32xbf16>, vector<32x64xbf16>, vector<16x64xf32> -> vector<16x64xf32>
    %131 = arith.addf %127, %130 : vector<16x64xf32>
    %c0_99 = arith.constant 0 : index
    %c0_100 = arith.constant 0 : index
    %132 = vector.load %arg11[%c0_99, %c0_100] : memref<1x64xf32, #tpu.memory_space<vmem>>, vector<1x64xf32>
    %133 = vector.broadcast %132 : vector<1x64xf32> to vector<16x64xf32>
    %134 = arith.addf %131, %133 : vector<16x64xf32>
    %cst_101 = arith.constant 0.000000e+00 : f32
    %135 = vector.broadcast %cst_101 : f32 to vector<16x64xf32>
    %136 = arith.maximumf %134, %135 : vector<16x64xf32>
    %137 = arith.truncf %136 : vector<16x64xf32> to vector<16x64xbf16>
    %c0_102 = arith.constant 0 : index
    %c0_103 = arith.constant 0 : index
    %138 = vector.load %arg12[%c0_102, %c0_103] : memref<64x32xbf16, #tpu.memory_space<vmem>>, vector<64x32xbf16>
    %cst_104 = arith.constant dense<0.000000e+00> : vector<16x32xf32>
    %139 = tpu.matmul %137, %138, %cst_104 {dimension_numbers = #tpu.dot_dimension_numbers<[1], [0], [0], [1], [0, 0, 1, 1], [], []>} : vector<16x64xbf16>, vector<64x32xbf16>, vector<16x32xf32> -> vector<16x32xf32>
    %c0_105 = arith.constant 0 : index
    %c0_106 = arith.constant 0 : index
    %140 = vector.load %arg13[%c0_105, %c0_106] : memref<1x32xf32, #tpu.memory_space<vmem>>, vector<1x32xf32>
    %141 = vector.broadcast %140 : vector<1x32xf32> to vector<16x32xf32>
    %142 = arith.addf %139, %141 : vector<16x32xf32>
    %143 = arith.truncf %142 : vector<16x32xf32> to vector<16x32xbf16>
    %c0_107 = arith.constant 0 : index
    %c0_108 = arith.constant 0 : index
    %c0_109 = arith.constant 0 : index
    %144 = vector.load %arg14[%c0_107, %c0_108, %c0_109] : memref<1x16x32xbf16, #tpu.memory_space<vmem>>, vector<1x16x32xbf16>
    %145 = vector.shape_cast %144 : vector<1x16x32xbf16> to vector<16x32xbf16>
    %146 = vector.shape_cast %143 : vector<16x32xbf16> to vector<1x16x32xbf16>
    tpu.vector_store %arg14[%c0_107, %c0_108, %c0_109], %146 {strides = array<i32>} : memref<1x16x32xbf16, #tpu.memory_space<vmem>>, vector<1x16x32xbf16>,
    return
  }
  func.func @transform_0(%arg0: i32, %arg1: i32) -> (i32, i32, i32) {
    %c0_i32 = arith.constant 0 : i32
    %c0_i32_0 = arith.constant 0 : i32
    return %arg0, %arg1, %c0_i32 : i32, i32, i32
  }
  func.func @transform_1(%arg0: i32, %arg1: i32) -> (i32, i32, i32, i32) {
    %c0_i32 = arith.constant 0 : i32
    %c0_i32_0 = arith.constant 0 : i32
    %c0_i32_1 = arith.constant 0 : i32
    %c0_i32_2 = arith.constant 0 : i32
    return %arg0, %c0_i32, %c0_i32_0, %c0_i32_1 : i32, i32, i32, i32
  }
  func.func @transform_2(%arg0: i32, %arg1: i32) -> (i32, i32, i32, i32) {
    %c0_i32 = arith.constant 0 : i32
    %c0_i32_0 = arith.constant 0 : i32
    %c0_i32_1 = arith.constant 0 : i32
    %c0_i32_2 = arith.constant 0 : i32
    return %arg0, %c0_i32, %c0_i32_0, %c0_i32_1 : i32, i32, i32, i32
  }
  func.func @transform_3(%arg0: i32, %arg1: i32) -> (i32, i32, i32) {
    %c0_i32 = arith.constant 0 : i32
    %c0_i32_0 = arith.constant 0 : i32
    %c0_i32_1 = arith.constant 0 : i32
    %c0_i32_2 = arith.constant 0 : i32
    return %c0_i32, %c0_i32_0, %c0_i32_1 : i32, i32, i32
  }
  func.func @transform_4(%arg0: i32, %arg1: i32) -> (i32, i32, i32) {
    %c0_i32 = arith.constant 0 : i32
    %c0_i32_0 = arith.constant 0 : i32
    %c0_i32_1 = arith.constant 0 : i32
    %c0_i32_2 = arith.constant 0 : i32
    return %c0_i32, %c0_i32_0, %c0_i32_1 : i32, i32, i32
  }
  func.func @transform_5(%arg0: i32, %arg1: i32) -> (i32, i32, i32) {
    %c0_i32 = arith.constant 0 : i32
    %c0_i32_0 = arith.constant 0 : i32
    %c0_i32_1 = arith.constant 0 : i32
    %c0_i32_2 = arith.constant 0 : i32
    return %c0_i32, %c0_i32_0, %c0_i32_1 : i32, i32, i32
  }
  func.func @transform_6(%arg0: i32, %arg1: i32) -> (i32, i32) {
    %c0_i32 = arith.constant 0 : i32
    %c0_i32_0 = arith.constant 0 : i32
    %c0_i32_1 = arith.constant 0 : i32
    return %c0_i32, %c0_i32_0 : i32, i32
  }
  func.func @transform_7(%arg0: i32, %arg1: i32) -> (i32, i32) {
    %c0_i32 = arith.constant 0 : i32
    %c0_i32_0 = arith.constant 0 : i32
    %c0_i32_1 = arith.constant 0 : i32
    return %c0_i32, %c0_i32_0 : i32, i32
  }
  func.func @transform_8(%arg0: i32, %arg1: i32) -> (i32, i32) {
    %c0_i32 = arith.constant 0 : i32
    %c0_i32_0 = arith.constant 0 : i32
    %c0_i32_1 = arith.constant 0 : i32
    return %c0_i32, %c0_i32_0 : i32, i32
  }
  func.func @transform_9(%arg0: i32, %arg1: i32) -> (i32, i32) {
    %c0_i32 = arith.constant 0 : i32
    %c0_i32_0 = arith.constant 0 : i32
    %c0_i32_1 = arith.constant 0 : i32
    return %c0_i32, %c0_i32_0 : i32, i32
  }
  func.func @transform_10(%arg0: i32, %arg1: i32) -> (i32, i32) {
    %c0_i32 = arith.constant 0 : i32
    %c0_i32_0 = arith.constant 0 : i32
    %c0_i32_1 = arith.constant 0 : i32
    return %c0_i32, %c0_i32_0 : i32, i32
  }
  func.func @transform_11(%arg0: i32, %arg1: i32) -> (i32, i32) {
    %c0_i32 = arith.constant 0 : i32
    %c0_i32_0 = arith.constant 0 : i32
    %c0_i32_1 = arith.constant 0 : i32
    return %c0_i32, %c0_i32_0 : i32, i32
  }
  func.func @transform_12(%arg0: i32, %arg1: i32) -> (i32, i32, i32) {
    %c0_i32 = arith.constant 0 : i32
    %c0_i32_0 = arith.constant 0 : i32
    return %arg0, %arg1, %c0_i32 : i32, i32, i32
  }
}

module attributes {stable_mosaic.version = 11 : i64} {
  func.func @_attn_prop_kernel(%arg0: i32, %arg1: i32, %arg2: memref<1x16x32xbf16, #tpu.memory_space<vmem>>, %arg3: memref<1x4x8x8xbf16, #tpu.memory_space<vmem>>, %arg4: memref<1x4x8x8xbf16, #tpu.memory_space<vmem>>, %arg5: memref<4x32x8xbf16, #tpu.memory_space<vmem>>, %arg6: memref<4x1x8xf32, #tpu.memory_space<vmem>>, %arg7: memref<4x8x32xbf16, #tpu.memory_space<vmem>>, %arg8: memref<1x32xf32, #tpu.memory_space<vmem>>, %arg9: memref<32x64xbf16, #tpu.memory_space<vmem>>, %arg10: memref<32x64xbf16, #tpu.memory_space<vmem>>, %arg11: memref<1x64xf32, #tpu.memory_space<vmem>>, %arg12: memref<64x32xbf16, #tpu.memory_space<vmem>>, %arg13: memref<1x32xf32, #tpu.memory_space<vmem>>, %arg14: memref<1x16x32xbf16, #tpu.memory_space<vmem>>) attributes {dimension_semantics = [#tpu.dimension_semantics<parallel>, #tpu.dimension_semantics<parallel>], iteration_bounds = array<i64: 2, 1>, scalar_prefetch = 0 : i64, scratch_operands = 0 : i64, tpu.core_type = #tpu.core_type<tc>, window_params = [{transform_indices = @transform_0, window_bounds = array<i64: 1, 16, 32>}, {transform_indices = @transform_1, window_bounds = array<i64: 1, 4, 8, 8>}, {transform_indices = @transform_2, window_bounds = array<i64: 1, 4, 8, 8>}, {pipeline_mode = #tpu.pipeline_mode<synchronous>, transform_indices = @transform_3, window_bounds = array<i64: 4, 32, 8>}, {pipeline_mode = #tpu.pipeline_mode<synchronous>, transform_indices = @transform_4, window_bounds = array<i64: 4, 1, 8>}, {pipeline_mode = #tpu.pipeline_mode<synchronous>, transform_indices = @transform_5, window_bounds = array<i64: 4, 8, 32>}, {pipeline_mode = #tpu.pipeline_mode<synchronous>, transform_indices = @transform_6, window_bounds = array<i64: 1, 32>}, {pipeline_mode = #tpu.pipeline_mode<synchronous>, transform_indices = @transform_7, window_bounds = array<i64: 32, 64>}, {pipeline_mode = #tpu.pipeline_mode<synchronous>, transform_indices = @transform_8, window_bounds = array<i64: 32, 64>}, {pipeline_mode = #tpu.pipeline_mode<synchronous>, transform_indices = @transform_9, window_bounds = array<i64: 1, 64>}, {pipeline_mode = #tpu.pipeline_mode<synchronous>, transform_indices = @transform_10, window_bounds = array<i64: 64, 32>}, {pipeline_mode = #tpu.pipeline_mode<synchronous>, transform_indices = @transform_11, window_bounds = array<i64: 1, 32>}, {transform_indices = @transform_12, window_bounds = array<i64: 1, 16, 32>}]} {
    %c0 = arith.constant 0 : index
    %c0_0 = arith.constant 0 : index
    %c0_1 = arith.constant 0 : index
    %0 = vector.load %arg2[%c0, %c0_0, %c0_1] : memref<1x16x32xbf16, #tpu.memory_space<vmem>>, vector<1x16x32xbf16>
    %1 = vector.shape_cast %0 : vector<1x16x32xbf16> to vector<16x32xbf16>
    %cst = arith.constant 0.000000e+00 : f32
    %2 = vector.broadcast %cst : f32 to vector<16x32xf32>
    %c0_2 = arith.constant 0 : index
    %c0_3 = arith.constant 0 : index
    %c0_4 = arith.constant 0 : index
    %3 = vector.load %arg5[%c0_2, %c0_3, %c0_4] : memref<4x32x8xbf16, #tpu.memory_space<vmem>>, vector<1x32x8xbf16>
    %4 = vector.shape_cast %3 : vector<1x32x8xbf16> to vector<32x8xbf16>
    %cst_5 = arith.constant dense<0.000000e+00> : vector<16x8xf32>
    %5 = tpu.matmul %1, %4, %cst_5 {dimension_numbers = #tpu.dot_dimension_numbers<[1], [0], [0], [1], [0, 0, 1, 1], [], []>} : vector<16x32xbf16>, vector<32x8xbf16>, vector<16x8xf32> -> vector<16x8xf32>
    %c0_6 = arith.constant 0 : index
    %c0_7 = arith.constant 0 : index
    %c0_8 = arith.constant 0 : index
    %6 = vector.load %arg6[%c0_6, %c0_7, %c0_8] : memref<4x1x8xf32, #tpu.memory_space<vmem>>, vector<1x1x8xf32>
    %7 = vector.shape_cast %6 : vector<1x1x8xf32> to vector<1x8xf32>
    %8 = vector.broadcast %7 : vector<1x8xf32> to vector<16x8xf32>
    %9 = arith.addf %5, %8 : vector<16x8xf32>
    %10 = arith.truncf %9 : vector<16x8xf32> to vector<16x8xbf16>
    %c0_9 = arith.constant 0 : index
    %c0_10 = arith.constant 0 : index
    %c0_11 = arith.constant 0 : index
    %c0_12 = arith.constant 0 : index
    %11 = vector.load %arg3[%c0_9, %c0_10, %c0_11, %c0_12] : memref<1x4x8x8xbf16, #tpu.memory_space<vmem>>, vector<1x1x8x8xbf16>
    %12 = vector.shape_cast %11 : vector<1x1x8x8xbf16> to vector<8x8xbf16>
    %c0_13 = arith.constant 0 : index
    %c0_14 = arith.constant 0 : index
    %c0_15 = arith.constant 0 : index
    %c0_16 = arith.constant 0 : index
    %13 = vector.load %arg4[%c0_13, %c0_14, %c0_15, %c0_16] : memref<1x4x8x8xbf16, #tpu.memory_space<vmem>>, vector<1x1x8x8xbf16>
    %14 = vector.shape_cast %13 : vector<1x1x8x8xbf16> to vector<8x8xbf16>
    %cst_17 = arith.constant dense<0.000000e+00> : vector<16x8xf32>
    %15 = tpu.matmul %10, %12, %cst_17 {dimension_numbers = #tpu.dot_dimension_numbers<[1], [1], [0], [0], [0, 0, 1, 0], [], []>} : vector<16x8xbf16>, vector<8x8xbf16>, vector<16x8xf32> -> vector<16x8xf32>
    %cst_18 = arith.constant dense<0xFF800000> : vector<16xf32>
    %16 = vector.multi_reduction <maximumf>, %15, %cst_18 [1] : vector<16x8xf32> to vector<16xf32>
    %17 = vector.shape_cast %16 : vector<16xf32> to vector<16x1xf32>
    %18 = vector.broadcast %17 : vector<16x1xf32> to vector<16x8xf32>
    %19 = arith.subf %15, %18 : vector<16x8xf32>
    %20 = math.exp %19 : vector<16x8xf32>
    %cst_19 = arith.constant dense<0.000000e+00> : vector<16xf32>
    %21 = vector.multi_reduction <add>, %20, %cst_19 [1] : vector<16x8xf32> to vector<16xf32>
    %22 = vector.shape_cast %21 : vector<16xf32> to vector<16x1xf32>
    %23 = arith.truncf %20 : vector<16x8xf32> to vector<16x8xbf16>
    %cst_20 = arith.constant dense<0.000000e+00> : vector<16x8xf32>
    %24 = tpu.matmul %23, %14, %cst_20 {dimension_numbers = #tpu.dot_dimension_numbers<[1], [0], [0], [1], [0, 0, 1, 1], [], []>} : vector<16x8xbf16>, vector<8x8xbf16>, vector<16x8xf32> -> vector<16x8xf32>
    %25 = tpu.reciprocal %22 {approx = true} : vector<16x1xf32> -> vector<16x1xf32>
    %26 = vector.broadcast %25 : vector<16x1xf32> to vector<16x8xf32>
    %27 = arith.mulf %24, %26 : vector<16x8xf32>
    %28 = arith.truncf %27 : vector<16x8xf32> to vector<16x8xbf16>
    %c0_21 = arith.constant 0 : index
    %c0_22 = arith.constant 0 : index
    %c0_23 = arith.constant 0 : index
    %29 = vector.load %arg7[%c0_21, %c0_22, %c0_23] : memref<4x8x32xbf16, #tpu.memory_space<vmem>>, vector<1x8x32xbf16>
    %30 = vector.shape_cast %29 : vector<1x8x32xbf16> to vector<8x32xbf16>
    %cst_24 = arith.constant dense<0.000000e+00> : vector<16x32xf32>
    %31 = tpu.matmul %28, %30, %cst_24 {dimension_numbers = #tpu.dot_dimension_numbers<[1], [0], [0], [1], [0, 0, 1, 1], [], []>} : vector<16x8xbf16>, vector<8x32xbf16>, vector<16x32xf32> -> vector<16x32xf32>
    %32 = arith.addf %2, %31 : vector<16x32xf32>
    %c1 = arith.constant 1 : index
    %c0_25 = arith.constant 0 : index
    %c0_26 = arith.constant 0 : index
    %33 = vector.load %arg5[%c1, %c0_25, %c0_26] : memref<4x32x8xbf16, #tpu.memory_space<vmem>>, vector<1x32x8xbf16>
    %34 = vector.shape_cast %33 : vector<1x32x8xbf16> to vector<32x8xbf16>
    %cst_27 = arith.constant dense<0.000000e+00> : vector<16x8xf32>
    %35 = tpu.matmul %1, %34, %cst_27 {dimension_numbers = #tpu.dot_dimension_numbers<[1], [0], [0], [1], [0, 0, 1, 1], [], []>} : vector<16x32xbf16>, vector<32x8xbf16>, vector<16x8xf32> -> vector<16x8xf32>
    %c1_28 = arith.constant 1 : index
    %c0_29 = arith.constant 0 : index
    %c0_30 = arith.constant 0 : index
    %36 = vector.load %arg6[%c1_28, %c0_29, %c0_30] : memref<4x1x8xf32, #tpu.memory_space<vmem>>, vector<1x1x8xf32>
    %37 = vector.shape_cast %36 : vector<1x1x8xf32> to vector<1x8xf32>
    %38 = vector.broadcast %37 : vector<1x8xf32> to vector<16x8xf32>
    %39 = arith.addf %35, %38 : vector<16x8xf32>
    %40 = arith.truncf %39 : vector<16x8xf32> to vector<16x8xbf16>
    %c0_31 = arith.constant 0 : index
    %c1_32 = arith.constant 1 : index
    %c0_33 = arith.constant 0 : index
    %c0_34 = arith.constant 0 : index
    %41 = vector.load %arg3[%c0_31, %c1_32, %c0_33, %c0_34] : memref<1x4x8x8xbf16, #tpu.memory_space<vmem>>, vector<1x1x8x8xbf16>
    %42 = vector.shape_cast %41 : vector<1x1x8x8xbf16> to vector<8x8xbf16>
    %c0_35 = arith.constant 0 : index
    %c1_36 = arith.constant 1 : index
    %c0_37 = arith.constant 0 : index
    %c0_38 = arith.constant 0 : index
    %43 = vector.load %arg4[%c0_35, %c1_36, %c0_37, %c0_38] : memref<1x4x8x8xbf16, #tpu.memory_space<vmem>>, vector<1x1x8x8xbf16>
    %44 = vector.shape_cast %43 : vector<1x1x8x8xbf16> to vector<8x8xbf16>
    %cst_39 = arith.constant dense<0.000000e+00> : vector<16x8xf32>
    %45 = tpu.matmul %40, %42, %cst_39 {dimension_numbers = #tpu.dot_dimension_numbers<[1], [1], [0], [0], [0, 0, 1, 0], [], []>} : vector<16x8xbf16>, vector<8x8xbf16>, vector<16x8xf32> -> vector<16x8xf32>
    %cst_40 = arith.constant dense<0xFF800000> : vector<16xf32>
    %46 = vector.multi_reduction <maximumf>, %45, %cst_40 [1] : vector<16x8xf32> to vector<16xf32>
    %47 = vector.shape_cast %46 : vector<16xf32> to vector<16x1xf32>
    %48 = vector.broadcast %47 : vector<16x1xf32> to vector<16x8xf32>
    %49 = arith.subf %45, %48 : vector<16x8xf32>
    %50 = math.exp %49 : vector<16x8xf32>
    %cst_41 = arith.constant dense<0.000000e+00> : vector<16xf32>
    %51 = vector.multi_reduction <add>, %50, %cst_41 [1] : vector<16x8xf32> to vector<16xf32>
    %52 = vector.shape_cast %51 : vector<16xf32> to vector<16x1xf32>
    %53 = arith.truncf %50 : vector<16x8xf32> to vector<16x8xbf16>
    %cst_42 = arith.constant dense<0.000000e+00> : vector<16x8xf32>
    %54 = tpu.matmul %53, %44, %cst_42 {dimension_numbers = #tpu.dot_dimension_numbers<[1], [0], [0], [1], [0, 0, 1, 1], [], []>} : vector<16x8xbf16>, vector<8x8xbf16>, vector<16x8xf32> -> vector<16x8xf32>
    %55 = tpu.reciprocal %52 {approx = true} : vector<16x1xf32> -> vector<16x1xf32>
    %56 = vector.broadcast %55 : vector<16x1xf32> to vector<16x8xf32>
    %57 = arith.mulf %54, %56 : vector<16x8xf32>
    %58 = arith.truncf %57 : vector<16x8xf32> to vector<16x8xbf16>
    %c1_43 = arith.constant 1 : index
    %c0_44 = arith.constant 0 : index
    %c0_45 = arith.constant 0 : index
    %59 = vector.load %arg7[%c1_43, %c0_44, %c0_45] : memref<4x8x32xbf16, #tpu.memory_space<vmem>>, vector<1x8x32xbf16>
    %60 = vector.shape_cast %59 : vector<1x8x32xbf16> to vector<8x32xbf16>
    %cst_46 = arith.constant dense<0.000000e+00> : vector<16x32xf32>
    %61 = tpu.matmul %58, %60, %cst_46 {dimension_numbers = #tpu.dot_dimension_numbers<[1], [0], [0], [1], [0, 0, 1, 1], [], []>} : vector<16x8xbf16>, vector<8x32xbf16>, vector<16x32xf32> -> vector<16x32xf32>
    %62 = arith.addf %32, %61 : vector<16x32xf32>
    %c2 = arith.constant 2 : index
    %c0_47 = arith.constant 0 : index
    %c0_48 = arith.constant 0 : index
    %63 = vector.load %arg5[%c2, %c0_47, %c0_48] : memref<4x32x8xbf16, #tpu.memory_space<vmem>>, vector<1x32x8xbf16>
    %64 = vector.shape_cast %63 : vector<1x32x8xbf16> to vector<32x8xbf16>
    %cst_49 = arith.constant dense<0.000000e+00> : vector<16x8xf32>
    %65 = tpu.matmul %1, %64, %cst_49 {dimension_numbers = #tpu.dot_dimension_numbers<[1], [0], [0], [1], [0, 0, 1, 1], [], []>} : vector<16x32xbf16>, vector<32x8xbf16>, vector<16x8xf32> -> vector<16x8xf32>
    %c2_50 = arith.constant 2 : index
    %c0_51 = arith.constant 0 : index
    %c0_52 = arith.constant 0 : index
    %66 = vector.load %arg6[%c2_50, %c0_51, %c0_52] : memref<4x1x8xf32, #tpu.memory_space<vmem>>, vector<1x1x8xf32>
    %67 = vector.shape_cast %66 : vector<1x1x8xf32> to vector<1x8xf32>
    %68 = vector.broadcast %67 : vector<1x8xf32> to vector<16x8xf32>
    %69 = arith.addf %65, %68 : vector<16x8xf32>
    %70 = arith.truncf %69 : vector<16x8xf32> to vector<16x8xbf16>
    %c0_53 = arith.constant 0 : index
    %c2_54 = arith.constant 2 : index
    %c0_55 = arith.constant 0 : index
    %c0_56 = arith.constant 0 : index
    %71 = vector.load %arg3[%c0_53, %c2_54, %c0_55, %c0_56] : memref<1x4x8x8xbf16, #tpu.memory_space<vmem>>, vector<1x1x8x8xbf16>
    %72 = vector.shape_cast %71 : vector<1x1x8x8xbf16> to vector<8x8xbf16>
    %c0_57 = arith.constant 0 : index
    %c2_58 = arith.constant 2 : index
    %c0_59 = arith.constant 0 : index
    %c0_60 = arith.constant 0 : index
    %73 = vector.load %arg4[%c0_57, %c2_58, %c0_59, %c0_60] : memref<1x4x8x8xbf16, #tpu.memory_space<vmem>>, vector<1x1x8x8xbf16>
    %74 = vector.shape_cast %73 : vector<1x1x8x8xbf16> to vector<8x8xbf16>
    %cst_61 = arith.constant dense<0.000000e+00> : vector<16x8xf32>
    %75 = tpu.matmul %70, %72, %cst_61 {dimension_numbers = #tpu.dot_dimension_numbers<[1], [1], [0], [0], [0, 0, 1, 0], [], []>} : vector<16x8xbf16>, vector<8x8xbf16>, vector<16x8xf32> -> vector<16x8xf32>
    %cst_62 = arith.constant dense<0xFF800000> : vector<16xf32>
    %76 = vector.multi_reduction <maximumf>, %75, %cst_62 [1] : vector<16x8xf32> to vector<16xf32>
    %77 = vector.shape_cast %76 : vector<16xf32> to vector<16x1xf32>
    %78 = vector.broadcast %77 : vector<16x1xf32> to vector<16x8xf32>
    %79 = arith.subf %75, %78 : vector<16x8xf32>
    %80 = math.exp %79 : vector<16x8xf32>
    %cst_63 = arith.constant dense<0.000000e+00> : vector<16xf32>
    %81 = vector.multi_reduction <add>, %80, %cst_63 [1] : vector<16x8xf32> to vector<16xf32>
    %82 = vector.shape_cast %81 : vector<16xf32> to vector<16x1xf32>
    %83 = arith.truncf %80 : vector<16x8xf32> to vector<16x8xbf16>
    %cst_64 = arith.constant dense<0.000000e+00> : vector<16x8xf32>
    %84 = tpu.matmul %83, %74, %cst_64 {dimension_numbers = #tpu.dot_dimension_numbers<[1], [0], [0], [1], [0, 0, 1, 1], [], []>} : vector<16x8xbf16>, vector<8x8xbf16>, vector<16x8xf32> -> vector<16x8xf32>
    %85 = tpu.reciprocal %82 {approx = true} : vector<16x1xf32> -> vector<16x1xf32>
    %86 = vector.broadcast %85 : vector<16x1xf32> to vector<16x8xf32>
    %87 = arith.mulf %84, %86 : vector<16x8xf32>
    %88 = arith.truncf %87 : vector<16x8xf32> to vector<16x8xbf16>
    %c2_65 = arith.constant 2 : index
    %c0_66 = arith.constant 0 : index
    %c0_67 = arith.constant 0 : index
    %89 = vector.load %arg7[%c2_65, %c0_66, %c0_67] : memref<4x8x32xbf16, #tpu.memory_space<vmem>>, vector<1x8x32xbf16>
    %90 = vector.shape_cast %89 : vector<1x8x32xbf16> to vector<8x32xbf16>
    %cst_68 = arith.constant dense<0.000000e+00> : vector<16x32xf32>
    %91 = tpu.matmul %88, %90, %cst_68 {dimension_numbers = #tpu.dot_dimension_numbers<[1], [0], [0], [1], [0, 0, 1, 1], [], []>} : vector<16x8xbf16>, vector<8x32xbf16>, vector<16x32xf32> -> vector<16x32xf32>
    %92 = arith.addf %62, %91 : vector<16x32xf32>
    %c3 = arith.constant 3 : index
    %c0_69 = arith.constant 0 : index
    %c0_70 = arith.constant 0 : index
    %93 = vector.load %arg5[%c3, %c0_69, %c0_70] : memref<4x32x8xbf16, #tpu.memory_space<vmem>>, vector<1x32x8xbf16>
    %94 = vector.shape_cast %93 : vector<1x32x8xbf16> to vector<32x8xbf16>
    %cst_71 = arith.constant dense<0.000000e+00> : vector<16x8xf32>
    %95 = tpu.matmul %1, %94, %cst_71 {dimension_numbers = #tpu.dot_dimension_numbers<[1], [0], [0], [1], [0, 0, 1, 1], [], []>} : vector<16x32xbf16>, vector<32x8xbf16>, vector<16x8xf32> -> vector<16x8xf32>
    %c3_72 = arith.constant 3 : index
    %c0_73 = arith.constant 0 : index
    %c0_74 = arith.constant 0 : index
    %96 = vector.load %arg6[%c3_72, %c0_73, %c0_74] : memref<4x1x8xf32, #tpu.memory_space<vmem>>, vector<1x1x8xf32>
    %97 = vector.shape_cast %96 : vector<1x1x8xf32> to vector<1x8xf32>
    %98 = vector.broadcast %97 : vector<1x8xf32> to vector<16x8xf32>
    %99 = arith.addf %95, %98 : vector<16x8xf32>
    %100 = arith.truncf %99 : vector<16x8xf32> to vector<16x8xbf16>
    %c0_75 = arith.constant 0 : index
    %c3_76 = arith.constant 3 : index
    %c0_77 = arith.constant 0 : index
    %c0_78 = arith.constant 0 : index
    %101 = vector.load %arg3[%c0_75, %c3_76, %c0_77, %c0_78] : memref<1x4x8x8xbf16, #tpu.memory_space<vmem>>, vector<1x1x8x8xbf16>
    %102 = vector.shape_cast %101 : vector<1x1x8x8xbf16> to vector<8x8xbf16>
    %c0_79 = arith.constant 0 : index
    %c3_80 = arith.constant 3 : index
    %c0_81 = arith.constant 0 : index
    %c0_82 = arith.constant 0 : index
    %103 = vector.load %arg4[%c0_79, %c3_80, %c0_81, %c0_82] : memref<1x4x8x8xbf16, #tpu.memory_space<vmem>>, vector<1x1x8x8xbf16>
    %104 = vector.shape_cast %103 : vector<1x1x8x8xbf16> to vector<8x8xbf16>
    %cst_83 = arith.constant dense<0.000000e+00> : vector<16x8xf32>
    %105 = tpu.matmul %100, %102, %cst_83 {dimension_numbers = #tpu.dot_dimension_numbers<[1], [1], [0], [0], [0, 0, 1, 0], [], []>} : vector<16x8xbf16>, vector<8x8xbf16>, vector<16x8xf32> -> vector<16x8xf32>
    %cst_84 = arith.constant dense<0xFF800000> : vector<16xf32>
    %106 = vector.multi_reduction <maximumf>, %105, %cst_84 [1] : vector<16x8xf32> to vector<16xf32>
    %107 = vector.shape_cast %106 : vector<16xf32> to vector<16x1xf32>
    %108 = vector.broadcast %107 : vector<16x1xf32> to vector<16x8xf32>
    %109 = arith.subf %105, %108 : vector<16x8xf32>
    %110 = math.exp %109 : vector<16x8xf32>
    %cst_85 = arith.constant dense<0.000000e+00> : vector<16xf32>
    %111 = vector.multi_reduction <add>, %110, %cst_85 [1] : vector<16x8xf32> to vector<16xf32>
    %112 = vector.shape_cast %111 : vector<16xf32> to vector<16x1xf32>
    %113 = arith.truncf %110 : vector<16x8xf32> to vector<16x8xbf16>
    %cst_86 = arith.constant dense<0.000000e+00> : vector<16x8xf32>
    %114 = tpu.matmul %113, %104, %cst_86 {dimension_numbers = #tpu.dot_dimension_numbers<[1], [0], [0], [1], [0, 0, 1, 1], [], []>} : vector<16x8xbf16>, vector<8x8xbf16>, vector<16x8xf32> -> vector<16x8xf32>
    %115 = tpu.reciprocal %112 {approx = true} : vector<16x1xf32> -> vector<16x1xf32>
    %116 = vector.broadcast %115 : vector<16x1xf32> to vector<16x8xf32>
    %117 = arith.mulf %114, %116 : vector<16x8xf32>
    %118 = arith.truncf %117 : vector<16x8xf32> to vector<16x8xbf16>
    %c3_87 = arith.constant 3 : index
    %c0_88 = arith.constant 0 : index
    %c0_89 = arith.constant 0 : index
    %119 = vector.load %arg7[%c3_87, %c0_88, %c0_89] : memref<4x8x32xbf16, #tpu.memory_space<vmem>>, vector<1x8x32xbf16>
    %120 = vector.shape_cast %119 : vector<1x8x32xbf16> to vector<8x32xbf16>
    %cst_90 = arith.constant dense<0.000000e+00> : vector<16x32xf32>
    %121 = tpu.matmul %118, %120, %cst_90 {dimension_numbers = #tpu.dot_dimension_numbers<[1], [0], [0], [1], [0, 0, 1, 1], [], []>} : vector<16x8xbf16>, vector<8x32xbf16>, vector<16x32xf32> -> vector<16x32xf32>
    %122 = arith.addf %92, %121 : vector<16x32xf32>
    %c0_91 = arith.constant 0 : index
    %c0_92 = arith.constant 0 : index
    %123 = vector.load %arg8[%c0_91, %c0_92] : memref<1x32xf32, #tpu.memory_space<vmem>>, vector<1x32xf32>
    %124 = vector.broadcast %123 : vector<1x32xf32> to vector<16x32xf32>
    %125 = arith.addf %122, %124 : vector<16x32xf32>
    %c0_93 = arith.constant 0 : index
    %c0_94 = arith.constant 0 : index
    %126 = vector.load %arg9[%c0_93, %c0_94] : memref<32x64xbf16, #tpu.memory_space<vmem>>, vector<32x64xbf16>
    %cst_95 = arith.constant dense<0.000000e+00> : vector<16x64xf32>
    %127 = tpu.matmul %1, %126, %cst_95 {dimension_numbers = #tpu.dot_dimension_numbers<[1], [0], [0], [1], [0, 0, 1, 1], [], []>} : vector<16x32xbf16>, vector<32x64xbf16>, vector<16x64xf32> -> vector<16x64xf32>
    %128 = arith.truncf %125 : vector<16x32xf32> to vector<16x32xbf16>
    %c0_96 = arith.constant 0 : index
    %c0_97 = arith.constant 0 : index
    %129 = vector.load %arg10[%c0_96, %c0_97] : memref<32x64xbf16, #tpu.memory_space<vmem>>, vector<32x64xbf16>
    %cst_98 = arith.constant dense<0.000000e+00> : vector<16x64xf32>
    %130 = tpu.matmul %128, %129, %cst_98 {dimension_numbers = #tpu.dot_dimension_numbers<[1], [0], [0], [1], [0, 0, 1, 1], [], []>} : vector<16x32xbf16>, vector<32x64xbf16>, vector<16x64xf32> -> vector<16x64xf32>
    %131 = arith.addf %127, %130 : vector<16x64xf32>
    %c0_99 = arith.constant 0 : index
    %c0_100 = arith.constant 0 : index
    %132 = vector.load %arg11[%c0_99, %c0_100] : memref<1x64xf32, #tpu.memory_space<vmem>>, vector<1x64xf32>
    %133 = vector.broadcast %132 : vector<1x64xf32> to vector<16x64xf32>
    %134 = arith.addf %131, %133 : vector<16x64xf32>
    %cst_101 = arith.constant 0.000000e+00 : f32
    %135 = vector.broadcast %cst_101 : f32 to vector<16x64xf32>
    %136 = arith.maximumf %134, %135 : vector<16x64xf32>
    %137 = arith.truncf %136 : vector<16x64xf32> to vector<16x64xbf16>
    %c0_102 = arith.constant 0 : index
    %c0_103 = arith.constant 0 : index
    %138 = vector.load %arg12[%c0_102, %c0_103] : memref<64x32xbf16, #tpu.memory_space<vmem>>, vector<64x32xbf16>
    %cst_104 = arith.constant dense<0.000000e+00> : vector<16x32xf32>
    %139 = tpu.matmul %137, %138, %cst_104 {dimension_numbers = #tpu.dot_dimension_numbers<[1], [0], [0], [1], [0, 0, 1, 1], [], []>} : vector<16x64xbf16>, vector<64x32xbf16>, vector<16x32xf32> -> vector<16x32xf32>
    %c0_105 = arith.constant 0 : index
    %c0_106 = arith.constant 0 : index
    %140 = vector.load %arg13[%c0_105, %c0_106] : memref<1x32xf32, #tpu.memory_space<vmem>>, vector<1x32xf32>
    %141 = vector.broadcast %140 : vector<1x32xf32> to vector<16x32xf32>
    %142 = arith.addf %139, %141 : vector<16x32xf32>
    %143 = arith.truncf %142 : vector<16x32xf32> to vector<16x32xbf16>
    %c0_107 = arith.constant 0 : index
    %c0_108 = arith.constant 0 : index
    %c0_109 = arith.constant 0 : index
    %144 = vector.load %arg14[%c0_107, %c0_108, %c0_109] : memref<1x16x32xbf16, #tpu.memory_space<vmem>>, vector<1x16x32xbf16>
    %145 = vector.shape_cast %144 : vector<1x16x32xbf16> to vector<16x32xbf16>
    %146 = vector.shape_cast %143 : vector<16x32xbf16> to vector<1x16x32xbf16>
    tpu.vector_store %arg14[%c0_107, %c0_108, %c0_109], %146 {strides = array<i32>} : memref<1x16x32xbf16, #tpu.memory_space<vmem>>, vector<1x16x32xbf16>,
    return
  }
  func.func @transform_0(%arg0: i32, %arg1: i32) -> (i32, i32, i32) {
    %c0_i32 = arith.constant 0 : i32
    %c0_i32_0 = arith.constant 0 : i32
    return %arg0, %arg1, %c0_i32 : i32, i32, i32
  }
  func.func @transform_1(%arg0: i32, %arg1: i32) -> (i32, i32, i32, i32) {
    %c0_i32 = arith.constant 0 : i32
    %c0_i32_0 = arith.constant 0 : i32
    %c0_i32_1 = arith.constant 0 : i32
    %c0_i32_2 = arith.constant 0 : i32
    return %arg0, %c0_i32, %c0_i32_0, %c0_i32_1 : i32, i32, i32, i32
  }
  func.func @transform_2(%arg0: i32, %arg1: i32) -> (i32, i32, i32, i32) {
    %c0_i32 = arith.constant 0 : i32
    %c0_i32_0 = arith.constant 0 : i32
    %c0_i32_1 = arith.constant 0 : i32
    %c0_i32_2 = arith.constant 0 : i32
    return %arg0, %c0_i32, %c0_i32_0, %c0_i32_1 : i32, i32, i32, i32
  }
  func.func @transform_3(%arg0: i32, %arg1: i32) -> (i32, i32, i32) {
    %c0_i32 = arith.constant 0 : i32
    %c0_i32_0 = arith.constant 0 : i32
    %c0_i32_1 = arith.constant 0 : i32
    %c0_i32_2 = arith.constant 0 : i32
    return %c0_i32, %c0_i32_0, %c0_i32_1 : i32, i32, i32
  }
  func.func @transform_4(%arg0: i32, %arg1: i32) -> (i32, i32, i32) {
    %c0_i32 = arith.constant 0 : i32
    %c0_i32_0 = arith.constant 0 : i32
    %c0_i32_1 = arith.constant 0 : i32
    %c0_i32_2 = arith.constant 0 : i32
    return %c0_i32, %c0_i32_0, %c0_i32_1 : i32, i32, i32
  }
  func.func @transform_5(%arg0: i32, %arg1: i32) -> (i32, i32, i32) {
    %c0_i32 = arith.constant 0 : i32
    %c0_i32_0 = arith.constant 0 : i32
    %c0_i32_1 = arith.constant 0 : i32
    %c0_i32_2 = arith.constant 0 : i32
    return %c0_i32, %c0_i32_0, %c0_i32_1 : i32, i32, i32
  }
  func.func @transform_6(%arg0: i32, %arg1: i32) -> (i32, i32) {
    %c0_i32 = arith.constant 0 : i32
    %c0_i32_0 = arith.constant 0 : i32
    %c0_i32_1 = arith.constant 0 : i32
    return %c0_i32, %c0_i32_0 : i32, i32
  }
  func.func @transform_7(%arg0: i32, %arg1: i32) -> (i32, i32) {
    %c0_i32 = arith.constant 0 : i32
    %c0_i32_0 = arith.constant 0 : i32
    %c0_i32_1 = arith.constant 0 : i32
    return %c0_i32, %c0_i32_0 : i32, i32
  }
  func.func @transform_8(%arg0: i32, %arg1: i32) -> (i32, i32) {
    %c0_i32 = arith.constant 0 : i32
    %c0_i32_0 = arith.constant 0 : i32
    %c0_i32_1 = arith.constant 0 : i32
    return %c0_i32, %c0_i32_0 : i32, i32
  }
  func.func @transform_9(%arg0: i32, %arg1: i32) -> (i32, i32) {
    %c0_i32 = arith.constant 0 : i32
    %c0_i32_0 = arith.constant 0 : i32
    %c0_i32_1 = arith.constant 0 : i32
    return %c0_i32, %c0_i32_0 : i32, i32
  }
  func.func @transform_10(%arg0: i32, %arg1: i32) -> (i32, i32) {
    %c0_i32 = arith.constant 0 : i32
    %c0_i32_0 = arith.constant 0 : i32
    %c0_i32_1 = arith.constant 0 : i32
    return %c0_i32, %c0_i32_0 : i32, i32
  }
  func.func @transform_11(%arg0: i32, %arg1: i32) -> (i32, i32) {
    %c0_i32 = arith.constant 0 : i32
    %c0_i32_0 = arith.constant 0 : i32
    %c0_i32_1 = arith.constant 0 : i32
    return %c0_i32, %c0_i32_0 : i32, i32
  }
  func.func @transform_12(%arg0: i32, %arg1: i32) -> (i32, i32, i32) {
    %c0_i32 = arith.constant 0 : i32
    %c0_i32_0 = arith.constant 0 : i32
    return %arg0, %arg1, %c0_i32 : i32, i32, i32
  }
}

</mosaic_0001>

<bundles_post_ra>
// kernel: tpu_custom_call.1
= control target key start
LH: loop header
LB: loop body
LE: loop exit
PB: predicated region body
PF: predicated region fallthrough
CT: control target
= control target key end

     0   :  { %s2761_s0 = inlined_call_operand.vmem [shape: bf16[2,16,32], index: 0, kind: input, shape index: {}]   ;;  %s2762_s1 = inlined_call_operand.vmem [shape: bf16[2,4,8,8], index: 1, kind: input, shape index: {}]   ;;  %s2763_s2 = inlined_call_operand.vmem [shape: bf16[2,4,8,8], index: 2, kind: input, shape index: {}]   ;;  %s2764_s3 = inlined_call_operand.vmem [shape: bf16[4,32,8], index: 3, kind: input, shape index: {}]   ;;  %s2765_s4 = inlined_call_operand.hbm [shape: f32[4,1,8], index: 4, kind: input, shape index: {}]   ;;  %s2766_s5 = inlined_call_operand.vmem [shape: bf16[4,8,32], index: 5, kind: input, shape index: {}]   ;;  %s2767_s6 = inlined_call_operand.vmem [shape: f32[1,32], index: 6, kind: input, shape index: {}]   ;;  %s2768_s7 = inlined_call_operand.vmem [shape: bf16[32,64], index: 7, kind: input, shape index: {}]   ;;  %s2769_s8 = inlined_call_operand.vmem [shape: bf16[32,64], index: 8, kind: input, shape index: {}]   ;;  %s2770_s9 = inlined_call_operand.vmem [shape: f32[1,64], index: 9, kind: input, shape index: {}]   ;;  %s2771_s10 = inlined_call_operand.vmem [shape: bf16[64,32], index: 10, kind: input, shape index: {}]   ;;  %s2772_s11 = inlined_call_operand.vmem [shape: f32[1,32], index: 11, kind: input, shape index: {}]   ;;  %s2773_s12 = inlined_call_operand.hbm [shape: bf16[2,16,32], index: 12, kind: output, shape index: {}]  }
   0x1   :  { %2775 = sst [smem:[#allocation9_spill]] %s2761_s0 }
   0x2   :  { %2776 = sst [smem:[#allocation10_spill]] %s2762_s1 }
   0x3   :  { %17 = vsyncpa [#allocation3], 0 }
   0x4   :  { %18 = vsyncpa [#allocation4], 0 }
   0x5   :  { %20 = vsyncpa [#allocation4 + $0x1], 0  ;;  %s2400_s21 = smov 0   ;;  %s2402_s22 = smov 0  }
   0x6   :  { %s2404_s23 = smov 0   ;;  %s2406_s24 = smov 0  }
   0x7   :  { %s2408_s25 = smov 0   ;;  %s2410_s26 = smov 0  }
   0x8 LB: > { %s1828_s27 = sadd.s32 4294967295, %s2325_s26   ;;  %s1829_s28 = sadd.s32 4294967294, %s2325_s26   ;;  %s2325_s26 = sphi %s2410_s26, %s26_s26   ;;  %s2321_s25 = sphi %s2408_s25, %s2789_s25   ;;  %s2317_s24 = sphi %s2406_s24, %s2788_s24   ;;  %s2313_s23 = sphi %s2404_s23, %s2787_s23   ;;  %s2309_s22 = sphi %s2402_s22, %s2786_s22   ;;  %s2305_s21 = sphi %s2400_s21, %s2785_s21  }
   0x9   : > { %s38_s29 = sadd.s32 1, %s2321_s25  ;;  %s316_s30 = sadd.s32 1, %s2313_s23 }
   0xa   : > { %p40_p0 = scmp.ge.s32.totalorder %s38_s29, 2  ;;  %p326_p1 = scmp.ne.s32.totalorder %s2313_s23, %s2309_s22 }
   0xb   : > { %p327_p2 = scmp.eq.s32.totalorder %s1828_s27, 1  ;;  %p332_p3 = scmp.ne.s32.totalorder %s2309_s22, %s2305_s21 }
   0xc   : > { %s2791_s29 = smov (%p40_p0, %s38_s29), 0  ;;  %p333_p5 = scmp.eq.s32.totalorder %s1829_s28, 1 }
   0xd   : > { %2777 = sst [smem:[#allocation8_spill]] %s2791_s29  ;;  %p2440_p4 = por %p327_p2, %p326_p1 }
   0xe   : > { %s311_s14 = ssub.s32 %s2321_s25, %s2791_s29  ;;  %p1830_p6 = scmp.ge.s32.totalorder %s2325_s26, 1 }
   0xf   : > { %p314_p7 = scmp.eq.s32.totalorder %s311_s14, 0  ;;  %p2447_p8 = por %p333_p5, %p332_p3 }
  0x10   : > { %p340_p9 = scmp.lt.s32.totalorder %s2325_s26, 3  ;;  %p2459_p11 = scmp.eq.s32.totalorder %s1828_s27, 0 }
  0x11   : > { %s2453_s16 = scalar_select %p314_p7, %s2313_s23, %s316_s30  }
  0x12   : > { %p2455_p10 = pnand %p1830_p6, %p340_p9  ;;  %s2327_s19 = smov [#allocation2]  }
  0x13   : > { %s355_s20 = sshll.u32 %s2327_s19, 4  ;;  %s356_s20 = int_to_ptr.vmem [resolvable:$true] %s355_s20 }
  0x14   : > { %p2104_p12 = pneg %p2455_p10  ;;  %s2230_s28 = scalar_lea.vmem %s356_s20, 64 }
  0x15   : > { %p2231_p1 = scmp.ne.s32.totalorder %s356_s20, %s2230_s28  ;;  %p2238_p5 = scmp.lt.s32.totalorder %s356_s20, %s356_s20 }
  0x16   : > { %p2105_p13 = pnand %p2459_p11, %p2104_p12  ;;  %p2239_p6 = scmp.lt.s32.totalorder %s2230_s28, %s2230_s28 }
  0x18   : > { %p2221_p0 = pneg %p2105_p13  ;;  %p2240_p7 = por %p2239_p6, %p2238_p5 }
  0x1a   : > { %p2233_p2 = pnand %p2231_p1, %p2221_p0 }
  0x1c   : > { %p2234_p3 = pneg %p2233_p2 }
  0x1e   : > { %p2241_p9 = pnand %p2240_p7, %p2234_p3 }
  0x20   : > { %2244 = shalt.err (!%p2241_p9)
}
  0x21   : > { %s2328_s27 = smov 16   ;;  %s2329_s30 = smov 1  }
  0x22   : > { %2107 = dma.hbm_to_vmem [thread:$0]  (!%p2105_p13), %s2765_s4, 64, %s356_s20, [#allocation3], %s2328_s27, %s2328_s27, %s2329_s30  }
  0x23   : > { %421 = sbr.rel (%p2455_p10) target bundleno = 3127 (0xc37), region = 68 }
  0x28   : > { %2296 = dma.done.wait (%p2459_p11), [#allocation3], 64  }
  0x29   : > { %2298 = vsyncadd (%p2459_p11), [#allocation3], 4294967232  ;;  %p478_p12 = scmp.lt.s32.totalorder %s2317_s24, 1  ;;  %v2330_v0 = vmov 0.0   ;;  %vm2331_vm0 = vmmov 0   ;;  %v2170_v1 = vld [vmem:[%s2764_s3 + $0x8] sm:$0xff]  }
  0x2a   : > { %1966 = vmatprep.subr.bf16.mxu1 %v2330_v0  ;;  %1970 = vmatprep.mubr.msk.bf16.mxu1 %vm2331_vm0, %v2330_v0  ;;  %s2782_s0 = sld [smem:[#allocation9_spill]]  ;;  %v2171_v2 = vld [vmem:[%s2764_s3] sm:$0xff]   ;;  %vm529_vm1 = vcmask 261120   ;;  %vm577_vm2 = vcmask 64512   ;;  %v2173_v13 = vld [vmem:[%s2764_s3 + $0x18] sm:$0xff]   ;;  %v2174_v15 = vld [vmem:[%s2764_s3 + $0x10] sm:$0xff]  }
  0x2b   : > { %s2481_s29 = scalar_select %p478_p12, %s2317_s24, 1  ;;  %1980 = vmatprep.subr.bf16.mxu0 %v2330_v0  ;;  %1982 = vmatprep.mubr.msk.bf16.mxu0 %vm2331_vm0, %v2330_v0  ;;  %v1842_v7 = vld [vmem:[#allocation2] ss:$0 sm:$0xff]  ;;  %v1853_v22 = vld [vmem:[#allocation2 + $0x1] ss:$0 sm:$0xff]  ;;  %vm647_vm3 = vcmask 1043456  }
  0x2c   : > { %1967 = vmatpush3.bf16.msra.mxu1 %v2170_v1  ;;  %s2783_s1 = sld [smem:[#allocation10_spill]]  ;;  %vm1641_vm4 = vcmask 523264   ;;  %vm1694_vm5 = vcmask 257024  }
  0x2d   : > { %s1913_s17 = sshll.u32 %s2481_s29, 3  ;;  %1968 = vmatprep.subr.bf16.mxu1 %v2330_v0 }
  0x30   : > { %s485_s27 = scalar_lea.vmem %s2782_s0, %s1913_s17  ;;  %1969 = vmatpush3.bf16.msra.mxu1 %v2171_v2  ;;  %s1914_s17 = sshll.u32 %s2481_s29, 4 }
  0x31   : > { %v2497_v3 = vld [vmem:[%s485_s27] sm:$0xff]   ;;  %1974 = vmatprep.subr.bf16.mxu1 %v2330_v0  ;;  %s2537_s28 = scalar_lea.vmem %s2763_s2, %s1914_s17  ;;  %s474_s27 = sand.u32 1, %s2309_s22  }
  0x32   : > { %s2510_s20 = scalar_lea.vmem %s2783_s1, %s1914_s17  ;;  %v576_v24 = vld [vmem:[%s2537_s28] sm:$0xf]  ;;  %v1858_v53 = vld [vmem:[%s2537_s28 + $0x4] sm:$0xf]  ;;  %s1835_s18 = sshll.u32 %s474_s27, 3 }
  0x33   : > { %1971 = vmatmul.mubr.msk.bf16.vlgmr.msra.gmra.mxu1 %vm529_vm1, %v2497_v3  ;;  %v575_v4 = vld [vmem:[%s2510_s20] sm:$0xf]  ;;  %v649_v26 = vsel %vm647_vm3, %v576_v24, 0  ;;  %v1857_v38 = vld [vmem:[%s2510_s20 + $0x4] sm:$0xf]  ;;  %v839_v54 = vsel %vm647_vm3, %v1858_v53, 0 }
  0x34   : > { %1976 = vmatprep.mubr.msk.bf16.mxu1 %vm2331_vm0, %v2330_v0  ;;  %v582_v5 = vsel %vm577_vm2, %v575_v4, 0  ;;  %1981 = vmatpush3.bf16.msra.mxu0 %v649_v26  ;;  %v773_v42 = vsel %vm577_vm2, %v1857_v38, 0  ;;  %s476_s19 = scalar_lea.vmem [#allocation5], %s1835_s18  ;;  %s2716_s30 = scalar_lea.sflag [#allocation4], %s474_s27 }
  0x35   : > { %1975 = vmatpush3.bf16.xpose.msra.mxu1 %v582_v5  ;;  %1994 = vmatprep.subr.bf16.mxu0 %v2330_v0 }
  0x36   : > { %1986 = vmatprep.subr.bf16.mxu1 %v2330_v0 }
  0xf3   : > { %v567_v6 = vpop.f32.mrf.mxu1 }
  0xf4   : > { %v568_v10 = vadd.f32 %v1842_v7, %v567_v6  ;;  %v697_v6 = vld [vmem:[%s2766_s5] sm:$0xf] }
  0xf5   : > { %v1972_v8 = vpop.f32.mrf.mxu1 }
  0xf6   : > { %v1861_v8 = vld [vmem:[%s2766_s5 + $0x4] sm:$0xf] }
  0xf7   : > { %v570_v9 = vpop.f32.mrf.mxu1 }
  0xf8   : > { %v571_v11 = vadd.f32 %v1842_v7, %v570_v9  ;;  %v940_v7 = vsel %vm647_vm3, %v697_v6, 0  ;;  %v893_v9 = vsel %vm647_vm3, %v1861_v8, 0  ;;  %v2178_v8 = vld [vmem:[%s2764_s3 + $0x30] sm:$0xff]  }
  0xf9   : > { %v1973_v12 = vpop.f32.mrf.mxu1 }
  0xfa   : > { %v574_v14 = vpack.c.bf16 %v571_v11, %v568_v10 }
  0xfc   : > { %1977 = vmatmul.mubr.msk.bf16.vlgmr.msra.gmra.mxu1 %vm577_vm2, %v574_v14 }
  0xfd   : > { %1987 = vmatpush3.bf16.msra.mxu1 %v2173_v13  ;;  %1990 = vmatprep.mubr.msk.bf16.mxu1 %vm2331_vm0, %v2330_v0 }
  0xfe   : > { %1988 = vmatprep.subr.bf16.mxu1 %v2330_v0 }
 0x101   : > { %1989 = vmatpush3.bf16.msra.mxu1 %v2174_v15 }
 0x102   : > { %2000 = vmatprep.subr.bf16.mxu1 %v2330_v0 }
 0x104   : > { %1991 = vmatmul.mubr.msk.bf16.vlgmr.msra.gmra.mxu1 %vm529_vm1, %v2497_v3 }
 0x105   : > { %2002 = vmatprep.mubr.msk.bf16.mxu1 %vm2331_vm0, %v2330_v0  ;;  %2001 = vmatpush3.bf16.msra.mxu1 %v839_v54 }
 0x106   : > { %2012 = vmatprep.subr.bf16.mxu1 %v2330_v0 }
 0x1bc   : > { %v618_v16 = vpop.f32.mrf.mxu1 }
 0x1bd   : > { %v625_v17 = vsel %vm577_vm2, %v618_v16, -inf }
 0x1be   : > { %626 = vmax.xlane.f32.xlu0 %v625_v17  ;;  %v1978_v18 = vpop.f32.mrf.mxu1 }
 0x1c0   : > { %v621_v19 = vpop.f32.mrf.mxu1 }
 0x1c1   : > { %v628_v20 = vsel %vm577_vm2, %v621_v19, -inf }
 0x1c2   : > { %629 = vmax.xlane.f32.xlu0 %v628_v20  ;;  %v1979_v21 = vpop.f32.mrf.mxu1 }
 0x1c4   : > { %v757_v23 = vpop.f32.mrf.mxu1 }
 0x1c5   : > { %v758_v27 = vadd.f32 %v1853_v22, %v757_v23 }
 0x1c6   : > { %v1992_v25 = vpop.f32.mrf.mxu1 }
 0x1c8   : > { %v760_v28 = vpop.f32.mrf.mxu1 }
 0x1c9   : > { %v761_v29 = vadd.f32 %v1853_v22, %v760_v28 }
 0x1ca   : > { %v1993_v30 = vpop.f32.mrf.mxu1 }
 0x1cb   : > { %v764_v31 = vpack.c.bf16 %v761_v29, %v758_v27  ;;  %v2175_v27 = vld [vmem:[%s2764_s3 + $0x28] sm:$0xff]   ;;  %v2176_v29 = vld [vmem:[%s2764_s3 + $0x20] sm:$0xff]  }
 0x1cc   : > { %v1872_v30 = vld [vmem:[%s2510_s20 + $0x8] sm:$0xf] }
 0x247   : > { %v627_v32 = vpop.xlane.xlu0 %626 }
 0x248   : > { %v631_v33 = vsub.f32 %v618_v16, %v627_v32 }
 0x24a   : > { %v633_v34 = vmul.f32 1.442695, %v631_v33 }
 0x24b   : > { %v630_v35 = vpop.xlane.xlu0 %629 }
 0x24c   : > { %v632_v36 = vsub.f32 %v621_v19, %v630_v35  ;;  %2187 = vpow2.f32 %v633_v34 }
 0x24e   : > { %v635_v37 = vmul.f32 1.442695, %v632_v36 }
 0x250   : > { %2189 = vpow2.f32 %v635_v37 }
 0x259   : > { %v2188_v39 = vpop.eup %2187 }
 0x25a   : > { %v637_v1 = vsel %vm577_vm2, %v2188_v39, 0.0 }
 0x25d   : > { %v2190_v40 = vpop.eup %2189 }
 0x25e   : > { %v643_v41 = vpack.c.bf16 %v2190_v40, %v2188_v39  ;;  %v640_v5 = vsel %vm577_vm2, %v2190_v40, 0.0 }
 0x260   : > { %1983 = vmatmul.mubr.msk.bf16.vlgmr.msra.gmra.mxu0 %vm577_vm2, %v643_v41 }
 0x261   : > { %1995 = vmatpush3.bf16.xpose.msra.mxu0 %v773_v42  ;;  %1996 = vmatprep.mubr.msk.bf16.mxu0 %vm2331_vm0, %v2330_v0 }
 0x262   : > { %2006 = vmatprep.subr.bf16.mxu0 %v2330_v0 }
 0x268   : > { %1997 = vmatmul.mubr.msk.bf16.vlgmr.msra.gmra.mxu0 %vm577_vm2, %v764_v31  ;;  %v1058_v31 = vsel %vm577_vm2, %v1872_v30, 0 }
 0x269   : > { %2008 = vmatprep.mubr.msk.bf16.mxu0 %vm2331_vm0, %v2330_v0  ;;  %2007 = vmatpush3.bf16.msra.mxu0 %v893_v9  ;;  %v1876_v9 = vld [vmem:[%s2766_s5 + $0x8] sm:$0xf] }
 0x26a   : > { %2018 = vmatprep.subr.bf16.mxu0 %v2330_v0 }
 0x320   : > { %v685_v43 = vpop.f32.mrf.mxu0 }
 0x322   : > { %v1984_v44 = vpop.f32.mrf.mxu0 }
 0x324   : > { %v688_v45 = vpop.f32.mrf.mxu0 }
 0x326   : > { %v1985_v46 = vpop.f32.mrf.mxu0 }
 0x328   : > { %v809_v47 = vpop.f32.mrf.mxu0 }
 0x329   : > { %v816_v48 = vsel %vm577_vm2, %v809_v47, -inf }
 0x32a   : > { %817 = vmax.xlane.f32.xlu1 %v816_v48  ;;  %v1998_v49 = vpop.f32.mrf.mxu0 }
 0x32c   : > { %v812_v50 = vpop.f32.mrf.mxu0 }
 0x32d   : > { %v819_v51 = vsel %vm577_vm2, %v812_v50, -inf }
 0x32e   : > { %820 = vmax.xlane.f32.xlu1 %v819_v51  ;;  %v1999_v52 = vpop.f32.mrf.mxu0 }
 0x3b3   : > { %v818_v55 = vpop.xlane.xlu1 %817 }
 0x3b4   : > { %v822_v56 = vsub.f32 %v809_v47, %v818_v55 }
 0x3b6   : > { %v824_v57 = vmul.f32 1.442695, %v822_v56  ;;  %v1873_v56 = vld [vmem:[%s2537_s28 + $0x8] sm:$0xf] }
 0x3b7   : > { %v821_v58 = vpop.xlane.xlu1 %820 }
 0x3b8   : > { %2191 = vpow2.f32 %v824_v57  ;;  %v823_v59 = vsub.f32 %v812_v50, %v821_v58  ;;  %v1124_v57 = vsel %vm647_vm3, %v1873_v56, 0 }
 0x3ba   : > { %v826_v60 = vmul.f32 1.442695, %v823_v59 }
 0x3bc   : > { %2193 = vpow2.f32 %v826_v60 }
 0x3c5   : > { %v2192_v61 = vpop.eup %2191 }
 0x3c6   : > { %v828_v62 = vsel %vm577_vm2, %v2192_v61, 0.0 }
 0x3c7   : > { %829 = vadd.xlane.f32.xlu0 %v828_v62 }
 0x3c9   : > { %v2194_v63 = vpop.eup %2193 }
 0x3ca   : > { %v831_v2 = vsel %vm577_vm2, %v2194_v63, 0.0  ;;  %v834_v4 = vpack.c.bf16 %v2194_v63, %v2192_v61 }
 0x3cb   : > { %638 = vadd.xlane.f32.xlu0 %v637_v1  ;;  %832 = vadd.xlane.f32.xlu1 %v831_v2 }
 0x3cc   : > { %2003 = vmatmul.mubr.msk.bf16.vlgmr.msra.gmra.mxu1 %vm577_vm2, %v834_v4 }
 0x3cd   : > { %2014 = vmatprep.mubr.msk.bf16.mxu1 %vm2331_vm0, %v2330_v0  ;;  %2013 = vmatpush3.bf16.msra.mxu1 %v940_v7 }
 0x3ce   : > { %2026 = vmatprep.subr.bf16.mxu1 %v2330_v0 }
 0x3cf   : > { %641 = vadd.xlane.f32.xlu1 %v640_v5  ;;  %v2177_v5 = vld [vmem:[%s2764_s3 + $0x38] sm:$0xff]  }
 0x450   : > { %v830_v10 = vpop.xlane.xlu0 %829 }
 0x454   : > { %v639_v11 = vpop.xlane.xlu0 %638  ;;  %v833_v12 = vpop.xlane.xlu1 %832 }
 0x455   : > { %2195 = vrcp.f32 %v639_v11 }
 0x458   : > { %v642_v13 = vpop.xlane.xlu1 %641 }
 0x459   : > { %2197 = vrcp.f32 %v642_v13 }
 0x45a   : > { %2199 = vrcp.f32 %v830_v10  ;;  %v1178_v10 = vsel %vm647_vm3, %v1876_v9, 0  ;;  %v2180_v9 = vld [vmem:[%s2768_s7] sm:$0xff]  }
 0x45b   : > { %2201 = vrcp.f32 %v833_v12 }
 0x462   : > { %v2196_v14 = vpop.eup %2195 }
 0x463   : > { %v694_v16 = vmul.f32 %v2196_v14, %v685_v43  ;;  %v1868_v43 = vld [vmem:[#allocation2 + $0x2] ss:$0 sm:$0xff] }
 0x466   : > { %v2198_v15 = vpop.eup %2197 }
 0x467   : > { %v695_v17 = vmul.f32 %v2198_v15, %v688_v45  ;;  %v2200_v21 = vpop.eup %2199 }
 0x468   : > { %v2202_v22 = vpop.eup %2201 }
 0x469   : > { %v696_v18 = vpack.c.bf16 %v695_v17, %v694_v16 }
 0x46b   : > { %2015 = vmatmul.mubr.msk.bf16.vlgmr.msra.gmra.mxu1 %vm577_vm2, %v696_v18  ;;  %v1886_v18 = vld [vmem:[%s2510_s20 + $0xc] sm:$0xf]  ;;  %s1713_s20 = sshll.u32 %s476_s19, 4  ;;  %s2714_s20 = int_to_ptr.vmem [resolvable:$true] %s1713_s20 }
 0x46c   : > { %2028 = vmatprep.mubr.msk.bf16.mxu1 %vm2331_vm0, %v2330_v0  ;;  %2027 = vmatpush3.bf16.xpose.msra.mxu1 %v1058_v31  ;;  %s2245_s14 = scalar_lea.vmem %s2714_s20, 128 }
 0x46d   : > { %2038 = vmatprep.subr.bf16.mxu1 %v2330_v0  ;;  %p2246_p10 = scmp.ne.s32.totalorder %s2714_s20, %s2245_s14 }
 0x46f   : > { %p2247_p11 = pnand %p2246_p10, %p2440_p4 }
 0x471   : > { %p2248_p13 = pneg %p2247_p11 }
 0x48c   : > { %v875_v19 = vpop.f32.mrf.mxu1 }
 0x48d   : > { %v884_v24 = vmul.f32 %v2200_v21, %v875_v19 }
 0x48e   : > { %v2004_v20 = vpop.f32.mrf.mxu1 }
 0x490   : > { %v878_v23 = vpop.f32.mrf.mxu1 }
 0x491   : > { %v885_v25 = vmul.f32 %v2202_v22, %v878_v23  ;;  %v1298_v23 = vsel %vm577_vm2, %v1886_v18, 0 }
 0x492   : > { %v2005_v26 = vpop.f32.mrf.mxu1 }
 0x493   : > { %v886_v28 = vpack.c.bf16 %v885_v25, %v884_v24  ;;  %v1882_v25 = vld [vmem:[#allocation2 + $0x3] ss:$0 sm:$0xff] }
 0x495   : > { %2009 = vmatmul.mubr.msk.bf16.vlgmr.msra.gmra.mxu0 %vm577_vm2, %v886_v28 }
 0x496   : > { %2019 = vmatpush3.bf16.msra.mxu0 %v2175_v27  ;;  %2022 = vmatprep.mubr.msk.bf16.mxu0 %vm2331_vm0, %v2330_v0 }
 0x497   : > { %2020 = vmatprep.subr.bf16.mxu0 %v2330_v0 }
 0x49a   : > { %2021 = vmatpush3.bf16.msra.mxu0 %v2176_v29 }
 0x49b   : > { %2032 = vmatprep.subr.bf16.mxu0 %v2330_v0 }
 0x49d   : > { %2023 = vmatmul.mubr.msk.bf16.vlgmr.msra.gmra.mxu0 %vm529_vm1, %v2497_v3 }
 0x49e   : > { %2034 = vmatprep.mubr.msk.bf16.mxu0 %vm2331_vm0, %v2330_v0  ;;  %2033 = vmatpush3.bf16.msra.mxu0 %v1124_v57  ;;  %v1890_v57 = vld [vmem:[%s2766_s5 + $0xc] sm:$0xf] }
 0x49f   : > { %2044 = vmatprep.subr.bf16.mxu0 %v2330_v0 }
 0x52b   : > { %v976_v32 = vpop.f32.mrf.mxu1 }
 0x52d   : > { %v2016_v33 = vpop.f32.mrf.mxu1 }
 0x52f   : > { %v979_v34 = vpop.f32.mrf.mxu1 }
 0x531   : > { %v2017_v35 = vpop.f32.mrf.mxu1 }
 0x555   : > { %v929_v36 = vpop.f32.mrf.mxu0 }
 0x556   : > { %v2594_v37 = vadd.f32 %v976_v32, %v929_v36 }
 0x557   : > { %v2010_v38 = vpop.f32.mrf.mxu0 }
 0x559   : > { %v932_v39 = vpop.f32.mrf.mxu0 }
 0x55a   : > { %v2596_v40 = vadd.f32 %v979_v34, %v932_v39 }
 0x55b   : > { %v2011_v41 = vpop.f32.mrf.mxu0 }
 0x55d   : > { %v1042_v42 = vpop.f32.mrf.mxu0 }
 0x55e   : > { %v1043_v46 = vadd.f32 %v1868_v43, %v1042_v42 }
 0x55f   : > { %v2024_v44 = vpop.f32.mrf.mxu0 }
 0x561   : > { %v1045_v45 = vpop.f32.mrf.mxu0 }
 0x562   : > { %v1046_v47 = vadd.f32 %v1868_v43, %v1045_v45 }
 0x563   : > { %v2025_v48 = vpop.f32.mrf.mxu0 }
 0x564   : > { %v1049_v49 = vpack.c.bf16 %v1046_v47, %v1043_v46  ;;  %v1887_v46 = vld [vmem:[%s2537_s28 + $0xc] sm:$0xf]  ;;  %s1918_s28 = sshll.u32 %s2317_s24, 7  ;;  %s2332_s24 = smov [#allocation5]  }
 0x565   : > { %s2712_s0 = scalar_lea.hbm %s2773_s12, %s1918_s28  ;;  %s2249_s18 = sshll.u32 %s2332_s24, 4  ;;  %s2250_s18 = int_to_ptr.vmem [resolvable:$false] %s2249_s18 }
 0x566   : > { %2029 = vmatmul.mubr.msk.bf16.vlgmr.msra.gmra.mxu1 %vm577_vm2, %v1049_v49  ;;  %s2251_s29 = scalar_lea.vmem %s2250_s18, 256  ;;  %p2252_p0 = scmp.lt.s32.totalorder %s2714_s20, %s2250_s18 }
 0x567   : > { %2040 = vmatprep.mubr.msk.bf16.mxu1 %vm2331_vm0, %v2330_v0  ;;  %2039 = vmatpush3.bf16.msra.mxu1 %v1178_v10  ;;  %v2181_v10 = vld [vmem:[%s2769_s8 + $0x8] sm:$0xff]   ;;  %p2253_p1 = scmp.lt.s32.totalorder %s2251_s29, %s2245_s14 }
 0x568   : > { %2052 = vmatprep.subr.bf16.mxu1 %v2330_v0 }
 0x569   : > { %p2254_p2 = por %p2253_p1, %p2252_p0 }
 0x56b   : > { %p2255_p3 = pnand %p2254_p2, %p2248_p13 }
 0x626   : > { %v1094_v50 = vpop.f32.mrf.mxu1 }
 0x627   : > { %v1101_v51 = vsel %vm577_vm2, %v1094_v50, -inf }
 0x628   : > { %1102 = vmax.xlane.f32.xlu0 %v1101_v51  ;;  %v2030_v52 = vpop.f32.mrf.mxu1 }
 0x62a   : > { %v1097_v53 = vpop.f32.mrf.mxu1 }
 0x62b   : > { %v1104_v54 = vsel %vm577_vm2, %v1097_v53, -inf }
 0x62c   : > { %1105 = vmax.xlane.f32.xlu1 %v1104_v54  ;;  %v2031_v55 = vpop.f32.mrf.mxu1 }
 0x6b1   : > { %v1103_v58 = vpop.xlane.xlu0 %1102 }
 0x6b2   : > { %v1107_v59 = vsub.f32 %v1094_v50, %v1103_v58  ;;  %v1418_v58 = vsel %vm647_vm3, %v1890_v57, 0 }
 0x6b4   : > { %v1109_v60 = vmul.f32 1.442695, %v1107_v59 }
 0x6b5   : > { %v1106_v61 = vpop.xlane.xlu1 %1105 }
 0x6b6   : > { %2203 = vpow2.f32 %v1109_v60  ;;  %v1108_v62 = vsub.f32 %v1097_v53, %v1106_v61 }
 0x6b8   : > { %v1111_v63 = vmul.f32 1.442695, %v1108_v62 }
 0x6ba   : > { %2205 = vpow2.f32 %v1111_v63 }
 0x6c3   : > { %v2204_v1 = vpop.eup %2203 }
 0x6c4   : > { %v1113_v2 = vsel %vm577_vm2, %v2204_v1, 0.0 }
 0x6c5   : > { %1114 = vadd.xlane.f32.xlu0 %v1113_v2 }
 0x6c7   : > { %v2206_v4 = vpop.eup %2205 }
 0x6c8   : > { %v1116_v6 = vsel %vm577_vm2, %v2206_v4, 0.0  ;;  %v1119_v7 = vpack.c.bf16 %v2206_v4, %v2204_v1 }
 0x6c9   : > { %1117 = vadd.xlane.f32.xlu1 %v1116_v6 }
 0x6ca   : > { %2035 = vmatmul.mubr.msk.bf16.vlgmr.msra.gmra.mxu0 %vm577_vm2, %v1119_v7  ;;  %v2179_v7 = vld [vmem:[%s2768_s7 + $0x8] sm:$0xff]  }
 0x6cb   : > { %2045 = vmatpush3.bf16.msra.mxu0 %v2177_v5  ;;  %2048 = vmatprep.mubr.msk.bf16.mxu0 %vm2331_vm0, %v2330_v0 }
 0x6cc   : > { %2046 = vmatprep.subr.bf16.mxu0 %v2330_v0 }
 0x6cf   : > { %2047 = vmatpush3.bf16.msra.mxu0 %v2178_v8 }
 0x6d0   : > { %2058 = vmatprep.subr.bf16.mxu0 %v2330_v0 }
 0x6d2   : > { %2049 = vmatmul.mubr.msk.bf16.vlgmr.msra.gmra.mxu0 %vm529_vm1, %v2497_v3 }
 0x6d3   : > { %2060 = vmatprep.mubr.msk.bf16.mxu0 %vm2331_vm0, %v2330_v0 }
 0x74e   : > { %v1115_v11 = vpop.xlane.xlu0 %1114 }
 0x74f   : > { %2207 = vrcp.f32 %v1115_v11  ;;  %v2182_v11 = vld [vmem:[%s2769_s8] sm:$0xff]  }
 0x752   : > { %v1118_v12 = vpop.xlane.xlu1 %1117 }
 0x753   : > { %2209 = vrcp.f32 %v1118_v12 }
 0x75c   : > { %v2208_v15 = vpop.eup %2207 }
 0x760   : > { %v2210_v16 = vpop.eup %2209 }
 0x78a   : > { %v1160_v13 = vpop.f32.mrf.mxu0 }
 0x78b   : > { %v1169_v19 = vmul.f32 %v2208_v15, %v1160_v13  ;;  %v1892_v15 = vld [vmem:[%s2767_s6] ss:$0 sm:$0xff] }
 0x78c   : > { %v2036_v14 = vpop.f32.mrf.mxu0 }
 0x78e   : > { %v1163_v17 = vpop.f32.mrf.mxu0 }
 0x78f   : > { %v1170_v20 = vmul.f32 %v2210_v16, %v1163_v17 }
 0x790   : > { %v2037_v21 = vpop.f32.mrf.mxu0 }
 0x791   : > { %v1171_v22 = vpack.c.bf16 %v1170_v20, %v1169_v19  ;;  %v2183_v20 = vld [vmem:[%s2771_s10 + $0x18] sm:$0xff]  }
 0x792   : > { %v1282_v24 = vpop.f32.mrf.mxu0 }
 0x793   : > { %2041 = vmatmul.mubr.msk.bf16.vlgmr.msra.gmra.mxu1 %vm577_vm2, %v1171_v22  ;;  %v1283_v28 = vadd.f32 %v1882_v25, %v1282_v24 }
 0x794   : > { %2053 = vmatpush3.bf16.xpose.msra.mxu1 %v1298_v23  ;;  %v2050_v26 = vpop.f32.mrf.mxu0  ;;  %2054 = vmatprep.mubr.msk.bf16.mxu1 %vm2331_vm0, %v2330_v0 }
 0x795   : > { %2064 = vmatprep.subr.bf16.mxu1 %v2330_v0  ;;  %v2184_v26 = vld [vmem:[%s2771_s10 + $0x10] sm:$0xff]  }
 0x796   : > { %v1285_v27 = vpop.f32.mrf.mxu0 }
 0x797   : > { %v1286_v29 = vadd.f32 %v1882_v25, %v1285_v27  ;;  %v2185_v27 = vld [vmem:[%s2771_s10 + $0x8] sm:$0xff]  }
 0x798   : > { %v2051_v30 = vpop.f32.mrf.mxu0 }
 0x799   : > { %v1289_v31 = vpack.c.bf16 %v1286_v29, %v1283_v28  ;;  %v2186_v28 = vld [vmem:[%s2771_s10] sm:$0xff]  }
 0x79b   : > { %2055 = vmatmul.mubr.msk.bf16.vlgmr.msra.gmra.mxu1 %vm577_vm2, %v1289_v31  ;;  %v1899_v31 = vld [vmem:[%s2770_s9] ss:$0 sm:$0xff] }
 0x79c   : > { %2066 = vmatprep.mubr.msk.bf16.mxu1 %vm2331_vm0, %v2330_v0  ;;  %2065 = vmatpush3.bf16.msra.mxu1 %v1418_v58 }
 0x79d   : > { %2078 = vmatprep.subr.bf16.mxu1 %v2330_v0 }
 0x853   : > { %v1214_v32 = vpop.f32.mrf.mxu1 }
 0x854   : > { %v2638_v33 = vadd.f32 %v1214_v32, %v2594_v37  ;;  %v1364_v37 = vsel %vm647_vm3, %v1887_v46, 0 }
 0x855   : > { %v2042_v34 = vpop.f32.mrf.mxu1  ;;  %2059 = vmatpush3.bf16.msra.mxu0 %v1364_v37 }
 0x856   : > { %2070 = vmatprep.subr.bf16.mxu0 %v2330_v0 }
 0x857   : > { %v1217_v35 = vpop.f32.mrf.mxu1 }
 0x858   : > { %v2641_v36 = vadd.f32 %v1217_v35, %v2596_v40 }
 0x859   : > { %v2043_v38 = vpop.f32.mrf.mxu1 }
 0x85b   : > { %v1334_v39 = vpop.f32.mrf.mxu1 }
 0x85c   : > { %v1341_v41 = vsel %vm577_vm2, %v1334_v39, -inf }
 0x85d   : > { %1342 = vmax.xlane.f32.xlu0 %v1341_v41  ;;  %v2056_v42 = vpop.f32.mrf.mxu1 }
 0x85e   : > { %v1900_v42 = vld [vmem:[%s2772_s11] ss:$0 sm:$0xff] }
 0x85f   : > { %v1337_v43 = vpop.f32.mrf.mxu1 }
 0x860   : > { %v1344_v44 = vsel %vm577_vm2, %v1337_v43, -inf }
 0x861   : > { %1345 = vmax.xlane.f32.xlu1 %v1344_v44  ;;  %v2057_v45 = vpop.f32.mrf.mxu1 }
 0x8e6   : > { %v1343_v47 = vpop.xlane.xlu0 %1342 }
 0x8e7   : > { %v1347_v40 = vsub.f32 %v1334_v39, %v1343_v47 }
 0x8e9   : > { %v1349_v48 = vmul.f32 1.442695, %v1347_v40 }
 0x8ea   : > { %v1346_v49 = vpop.xlane.xlu1 %1345 }
 0x8eb   : > { %2211 = vpow2.f32 %v1349_v48  ;;  %v1348_v50 = vsub.f32 %v1337_v43, %v1346_v49 }
 0x8ed   : > { %v1351_v51 = vmul.f32 1.442695, %v1348_v50 }
 0x8ef   : > { %2213 = vpow2.f32 %v1351_v51 }
 0x8f8   : > { %v2212_v52 = vpop.eup %2211 }
 0x8f9   : > { %v1353_v53 = vsel %vm577_vm2, %v2212_v52, 0.0 }
 0x8fa   : > { %1354 = vadd.xlane.f32.xlu0 %v1353_v53 }
 0x8fc   : > { %v2214_v54 = vpop.eup %2213 }
 0x8fd   : > { %v1356_v55 = vsel %vm577_vm2, %v2214_v54, 0.0  ;;  %v1359_v56 = vpack.c.bf16 %v2214_v54, %v2212_v52 }
 0x8fe   : > { %1357 = vadd.xlane.f32.xlu1 %v1356_v55 }
 0x8ff   : > { %2061 = vmatmul.mubr.msk.bf16.vlgmr.msra.gmra.mxu0 %vm577_vm2, %v1359_v56 }
 0x900   : > { %2074 = vmatprep.mubr.msk.bf16.mxu0 %vm2331_vm0, %v2330_v0  ;;  %2071 = vmatpush3.bf16.msra.mxu0 %v2181_v10 }
 0x901   : > { %2072 = vmatprep.subr.bf16.mxu0 %v2330_v0 }
 0x904   : > { %2073 = vmatpush3.bf16.msra.mxu0 %v2182_v11 }
 0x905   : > { %2086 = vmatprep.subr.bf16.mxu0 %v2330_v0 }
 0x983   : > { %v1355_v59 = vpop.xlane.xlu0 %1354 }
 0x984   : > { %2215 = vrcp.f32 %v1355_v59 }
 0x987   : > { %v1358_v60 = vpop.xlane.xlu1 %1357 }
 0x988   : > { %2217 = vrcp.f32 %v1358_v60 }
 0x991   : > { %v2216_v63 = vpop.eup %2215 }
 0x995   : > { %v2218_v1 = vpop.eup %2217 }
 0x9bf   : > { %v1400_v61 = vpop.f32.mrf.mxu0 }
 0x9c0   : > { %v1409_v4 = vmul.f32 %v2216_v63, %v1400_v61 }
 0x9c1   : > { %v2062_v62 = vpop.f32.mrf.mxu0 }
 0x9c3   : > { %v1403_v2 = vpop.f32.mrf.mxu0 }
 0x9c4   : > { %v1410_v5 = vmul.f32 %v2218_v1, %v1403_v2 }
 0x9c5   : > { %v2063_v6 = vpop.f32.mrf.mxu0 }
 0x9c6   : > { %v1411_v8 = vpack.c.bf16 %v1410_v5, %v1409_v4 }
 0x9c8   : > { %2067 = vmatmul.mubr.msk.bf16.vlgmr.msra.gmra.mxu1 %vm577_vm2, %v1411_v8 }
 0x9c9   : > { %2079 = vmatpush3.bf16.msra.mxu1 %v2179_v7  ;;  %2082 = vmatprep.mubr.msk.bf16.mxu1 %vm2331_vm0, %v2330_v0 }
 0x9ca   : > { %2080 = vmatprep.subr.bf16.mxu1 %v2330_v0 }
 0x9cd   : > { %2081 = vmatpush3.bf16.msra.mxu1 %v2180_v9 }
 0x9d0   : > { %2083 = vmatmul.mubr.msk.bf16.vlgmr.msra.gmra.mxu1 %vm529_vm1, %v2497_v3 }
 0xa88   : > { %v1454_v12 = vpop.f32.mrf.mxu1 }
 0xa89   : > { %v1461_v14 = vadd.f32 %v1454_v12, %v2638_v33 }
 0xa8a   : > { %v2068_v13 = vpop.f32.mrf.mxu1 }
 0xa8b   : > { %v1470_v18 = vadd.f32 %v1892_v15, %v1461_v14 }
 0xa8c   : > { %v1457_v16 = vpop.f32.mrf.mxu1 }
 0xa8d   : > { %v1462_v3 = vadd.f32 %v1457_v16, %v2641_v36 }
 0xa8e   : > { %v2069_v17 = vpop.f32.mrf.mxu1 }
 0xa8f   : > { %v1471_v19 = vadd.f32 %v1892_v15, %v1462_v3 }
 0xa90   : > { %v1583_v22 = vpop.f32.mrf.mxu1 }
 0xa91   : > { %v1476_v21 = vpack.c.bf16 %v1471_v19, %v1470_v18 }
 0xa92   : > { %v2084_v23 = vpop.f32.mrf.mxu1 }
 0xa93   : > { %2075 = vmatmul.mubr.msk.bf16.vlgmr.msra.gmra.mxu0 %vm529_vm1, %v1476_v21 }
 0xa94   : > { %2087 = vmatpush3.bf16.msra.mxu0 %v2183_v20  ;;  %2094 = vmatprep.mubr.msk.bf16.mxu0 %vm2331_vm0, %v2330_v0  ;;  %v1586_v24 = vpop.f32.mrf.mxu1 }
 0xa95   : > { %2088 = vmatprep.subr.bf16.mxu0 %v2330_v0 }
 0xa96   : > { %v2085_v25 = vpop.f32.mrf.mxu1 }
 0xa98   : > { %2089 = vmatpush3.bf16.msra.mxu0 %v2184_v26 }
 0xa99   : > { %2090 = vmatprep.subr.bf16.mxu0 %v2330_v0 }
 0xa9c   : > { %2091 = vmatpush3.bf16.msra.mxu0 %v2185_v27 }
 0xa9d   : > { %2092 = vmatprep.subr.bf16.mxu0 %v2330_v0 }
 0xaa0   : > { %2093 = vmatpush3.bf16.msra.mxu0 %v2186_v28 }
 0xb53   : > { %v1530_v29 = vpop.f32.mrf.mxu0 }
 0xb54   : > { %v1584_v30 = vadd.f32 %v1583_v22, %v1530_v29 }
 0xb55   : > { %v2076_v32 = vpop.f32.mrf.mxu0 }
 0xb56   : > { %v1597_v34 = vadd.f32 %v1899_v31, %v1584_v30 }
 0xb57   : > { %v1533_v33 = vpop.f32.mrf.mxu0 }
 0xb58   : > { %v1587_v35 = vadd.f32 %v1586_v24, %v1533_v33  ;;  %v1599_v0 = vmax.f32 %v1597_v34, 0.0 }
 0xb59   : > { %v2077_v36 = vpop.f32.mrf.mxu0 }
 0xb5a   : > { %v1598_v38 = vadd.f32 %v1899_v31, %v1587_v35 }
 0xb5c   : > { %v1600_v39 = vmax.f32 %v1598_v38, 0.0 }
 0xb5e   : > { %v1601_v41 = vpack.c.bf16 %v1600_v39, %v1599_v0 }
 0xb60   : > { %2095 = vmatmul.mubr.msk.bf16.vlgmr.msra.gmra.mxu0 %vm1641_vm4, %v1601_v41 }
 0xc20   : > { %v1679_v43 = vpop.f32.mrf.mxu0 }
 0xc21   : > { %v1680_v44 = vadd.f32 %v1900_v42, %v1679_v43 }
 0xc22   : > { %v2096_v45 = vpop.f32.mrf.mxu0 }
 0xc23   : > { %v1916_v46 = vpack.c.bf16 %v1680_v44, %v1680_v44 }
 0xc24   : > { %v1682_v37 = vpop.f32.mrf.mxu0 }
 0xc25   : > { %1695 = vst.msk [vmem:[%s476_s19] sm:$0xf] %vm1694_vm5, %v1916_v46  ;;  %v1683_v47 = vadd.f32 %v1900_v42, %v1682_v37 }
 0xc26   : > { %v2097_v40 = vpop.f32.mrf.mxu0 }
 0xc27   : > { %v1917_v48 = vpack.c.bf16 %v1683_v47, %v1683_v47 }
 0xc29   : > { %1696 = vst.msk [vmem:[%s476_s19 + $0x4] sm:$0xf] %vm1694_vm5, %v1917_v48 }
 0xc2a   : > { %2258 = shalt.err (!%p2255_p3)
}
 0xc2b   : > { %s2259_s27 = scalar_lea.hbm %s2712_s0, 128  ;;  %s2263_s17 = scalar_lea.hbm %s2773_s12, 256 }
 0xc2c   : > { %p2260_p5 = scmp.ne.s32.totalorder %s2712_s0, %s2259_s27  ;;  %p2264_p9 = scmp.lt.s32.totalorder %s2712_s0, %s2773_s12 }
 0xc2d   : > { %p2265_p12 = scmp.lt.s32.totalorder %s2263_s17, %s2259_s27 }
 0xc2e   : > { %p2261_p6 = pnand %p2260_p5, %p2440_p4 }
 0xc2f   : > { %p2266_p10 = por %p2265_p12, %p2264_p9 }
 0xc30   : > { %p2262_p7 = pneg %p2261_p6 }
 0xc32   : > { %p2267_p11 = pnand %p2266_p10, %p2262_p7 }
 0xc34   : > { %2270 = shalt.err (!%p2267_p11)
}
 0xc35   : > { %s2333_s14 = smov 64   ;;  %s2334_s18 = smov 4  }
 0xc36   : > { %2102 = dma.vmem_to_hbm [thread:$0]  (%p2440_p4), %s2714_s20, 128, %s2712_s0, %s2716_s30, %s2333_s14, %s2333_s14, %s2334_s18  }
 0xc37 PF: > { %p2114_p13 = scmp.ge.s32.totalorder %s2325_s26, 2  ;;  %s1728_s29 = sand.u32 1, %s2305_s21  }
 0xc38   : > { %s1729_s1 = scalar_lea.sflag [#allocation4], %s1728_s29 }
 0xc39   : > { %p2109_p0 = pnand %p2114_p13, %p2447_p8 }
 0xc3b   : > { %p2110_p1 = pneg %p2109_p0 }
 0xc3d   : > { %2300 = dma.done.wait (%p2110_p1), %s1729_s1, 128  }
 0xc3e   : > { %2302 = vsyncadd (%p2110_p1), %s1729_s1, 4294967168  ;;  %s26_s26 = sadd.s32 1, %s2325_s26   ;;  %s2784_s0 = sld [smem:[#allocation8_spill]] }
 0xc3f   : > { %p23_p2 = scmp.ge.s32.totalorder %s26_s26, 4   ;;  %s2785_s21 = smov %s2309_s22 }
 0xc40   : > { %s2786_s22 = smov %s2313_s23  ;;  %s2787_s23 = smov %s2453_s16 }
 0xc41   : > { %s2788_s24 = smov %s2321_s25  ;;  %25 = sbr.rel (!%p23_p2) target bundleno = 8 (0x8), region = 129 }
 0xc44   : > { %s2789_s25 = smov %s2784_s0 }
 0xc46   :  { %1734 = vsyncpa [#allocation3], 1 }
 0xc47   :  { %1736 = vsyncpa [#allocation3 + $0x1], 1 }
 0xc48   :  { %1737 = vsyncpa [#allocation4], 1 }
 0xc49   :  { %1739 = vsyncpa [#allocation4 + $0x1], 1 }

// kernel: tpu_custom_call.1
= control target key start
LH: loop header
LB: loop body
LE: loop exit
PB: predicated region body
PF: predicated region fallthrough
CT: control target
= control target key end

     0   :  { %s2761_s0 = inlined_call_operand.vmem [shape: bf16[2,16,32], index: 0, kind: input, shape index: {}]   ;;  %s2762_s1 = inlined_call_operand.vmem [shape: bf16[2,4,8,8], index: 1, kind: input, shape index: {}]   ;;  %s2763_s2 = inlined_call_operand.vmem [shape: bf16[2,4,8,8], index: 2, kind: input, shape index: {}]   ;;  %s2764_s3 = inlined_call_operand.vmem [shape: bf16[4,32,8], index: 3, kind: input, shape index: {}]   ;;  %s2765_s4 = inlined_call_operand.hbm [shape: f32[4,1,8], index: 4, kind: input, shape index: {}]   ;;  %s2766_s5 = inlined_call_operand.vmem [shape: bf16[4,8,32], index: 5, kind: input, shape index: {}]   ;;  %s2767_s6 = inlined_call_operand.vmem [shape: f32[1,32], index: 6, kind: input, shape index: {}]   ;;  %s2768_s7 = inlined_call_operand.vmem [shape: bf16[32,64], index: 7, kind: input, shape index: {}]   ;;  %s2769_s8 = inlined_call_operand.vmem [shape: bf16[32,64], index: 8, kind: input, shape index: {}]   ;;  %s2770_s9 = inlined_call_operand.vmem [shape: f32[1,64], index: 9, kind: input, shape index: {}]   ;;  %s2771_s10 = inlined_call_operand.vmem [shape: bf16[64,32], index: 10, kind: input, shape index: {}]   ;;  %s2772_s11 = inlined_call_operand.vmem [shape: f32[1,32], index: 11, kind: input, shape index: {}]   ;;  %s2773_s12 = inlined_call_operand.hbm [shape: bf16[2,16,32], index: 12, kind: output, shape index: {}]  }
   0x1   :  { %2775 = sst [smem:[#allocation9_spill]] %s2761_s0 }
   0x2   :  { %2776 = sst [smem:[#allocation10_spill]] %s2762_s1 }
   0x3   :  { %17 = vsyncpa [#allocation3], 0 }
   0x4   :  { %18 = vsyncpa [#allocation4], 0 }
   0x5   :  { %20 = vsyncpa [#allocation4 + $0x1], 0  ;;  %s2400_s21 = smov 0   ;;  %s2402_s22 = smov 0  }
   0x6   :  { %s2404_s23 = smov 0   ;;  %s2406_s24 = smov 0  }
   0x7   :  { %s2408_s25 = smov 0   ;;  %s2410_s26 = smov 0  }
   0x8 LB: > { %s1828_s27 = sadd.s32 4294967295, %s2325_s26   ;;  %s1829_s28 = sadd.s32 4294967294, %s2325_s26   ;;  %s2325_s26 = sphi %s2410_s26, %s26_s26   ;;  %s2321_s25 = sphi %s2408_s25, %s2789_s25   ;;  %s2317_s24 = sphi %s2406_s24, %s2788_s24   ;;  %s2313_s23 = sphi %s2404_s23, %s2787_s23   ;;  %s2309_s22 = sphi %s2402_s22, %s2786_s22   ;;  %s2305_s21 = sphi %s2400_s21, %s2785_s21  }
   0x9   : > { %s38_s29 = sadd.s32 1, %s2321_s25  ;;  %s316_s30 = sadd.s32 1, %s2313_s23 }
   0xa   : > { %p40_p0 = scmp.ge.s32.totalorder %s38_s29, 2  ;;  %p326_p1 = scmp.ne.s32.totalorder %s2313_s23, %s2309_s22 }
   0xb   : > { %p327_p2 = scmp.eq.s32.totalorder %s1828_s27, 1  ;;  %p332_p3 = scmp.ne.s32.totalorder %s2309_s22, %s2305_s21 }
   0xc   : > { %s2791_s29 = smov (%p40_p0, %s38_s29), 0  ;;  %p333_p5 = scmp.eq.s32.totalorder %s1829_s28, 1 }
   0xd   : > { %2777 = sst [smem:[#allocation8_spill]] %s2791_s29  ;;  %p2440_p4 = por %p327_p2, %p326_p1 }
   0xe   : > { %s311_s14 = ssub.s32 %s2321_s25, %s2791_s29  ;;  %p1830_p6 = scmp.ge.s32.totalorder %s2325_s26, 1 }
   0xf   : > { %p314_p7 = scmp.eq.s32.totalorder %s311_s14, 0  ;;  %p2447_p8 = por %p333_p5, %p332_p3 }
  0x10   : > { %p340_p9 = scmp.lt.s32.totalorder %s2325_s26, 3  ;;  %p2459_p11 = scmp.eq.s32.totalorder %s1828_s27, 0 }
  0x11   : > { %s2453_s16 = scalar_select %p314_p7, %s2313_s23, %s316_s30  }
  0x12   : > { %p2455_p10 = pnand %p1830_p6, %p340_p9  ;;  %s2327_s19 = smov [#allocation2]  }
  0x13   : > { %s355_s20 = sshll.u32 %s2327_s19, 4  ;;  %s356_s20 = int_to_ptr.vmem [resolvable:$true] %s355_s20 }
  0x14   : > { %p2104_p12 = pneg %p2455_p10  ;;  %s2230_s28 = scalar_lea.vmem %s356_s20, 64 }
  0x15   : > { %p2231_p1 = scmp.ne.s32.totalorder %s356_s20, %s2230_s28  ;;  %p2238_p5 = scmp.lt.s32.totalorder %s356_s20, %s356_s20 }
  0x16   : > { %p2105_p13 = pnand %p2459_p11, %p2104_p12  ;;  %p2239_p6 = scmp.lt.s32.totalorder %s2230_s28, %s2230_s28 }
  0x18   : > { %p2221_p0 = pneg %p2105_p13  ;;  %p2240_p7 = por %p2239_p6, %p2238_p5 }
  0x1a   : > { %p2233_p2 = pnand %p2231_p1, %p2221_p0 }
  0x1c   : > { %p2234_p3 = pneg %p2233_p2 }
  0x1e   : > { %p2241_p9 = pnand %p2240_p7, %p2234_p3 }
  0x20   : > { %2244 = shalt.err (!%p2241_p9)
}
  0x21   : > { %s2328_s27 = smov 16   ;;  %s2329_s30 = smov 1  }
  0x22   : > { %2107 = dma.hbm_to_vmem [thread:$0]  (!%p2105_p13), %s2765_s4, 64, %s356_s20, [#allocation3], %s2328_s27, %s2328_s27, %s2329_s30  }
  0x23   : > { %421 = sbr.rel (%p2455_p10) target bundleno = 3127 (0xc37), region = 68 }
  0x28   : > { %2296 = dma.done.wait (%p2459_p11), [#allocation3], 64  }
  0x29   : > { %2298 = vsyncadd (%p2459_p11), [#allocation3], 4294967232  ;;  %p478_p12 = scmp.lt.s32.totalorder %s2317_s24, 1  ;;  %v2330_v0 = vmov 0.0   ;;  %vm2331_vm0 = vmmov 0   ;;  %v2170_v1 = vld [vmem:[%s2764_s3 + $0x8] sm:$0xff]  }
  0x2a   : > { %1966 = vmatprep.subr.bf16.mxu1 %v2330_v0  ;;  %1970 = vmatprep.mubr.msk.bf16.mxu1 %vm2331_vm0, %v2330_v0  ;;  %s2782_s0 = sld [smem:[#allocation9_spill]]  ;;  %v2171_v2 = vld [vmem:[%s2764_s3] sm:$0xff]   ;;  %vm529_vm1 = vcmask 261120   ;;  %vm577_vm2 = vcmask 64512   ;;  %v2173_v13 = vld [vmem:[%s2764_s3 + $0x18] sm:$0xff]   ;;  %v2174_v15 = vld [vmem:[%s2764_s3 + $0x10] sm:$0xff]  }
  0x2b   : > { %s2481_s29 = scalar_select %p478_p12, %s2317_s24, 1  ;;  %1980 = vmatprep.subr.bf16.mxu0 %v2330_v0  ;;  %1982 = vmatprep.mubr.msk.bf16.mxu0 %vm2331_vm0, %v2330_v0  ;;  %v1842_v7 = vld [vmem:[#allocation2] ss:$0 sm:$0xff]  ;;  %v1853_v22 = vld [vmem:[#allocation2 + $0x1] ss:$0 sm:$0xff]  ;;  %vm647_vm3 = vcmask 1043456  }
  0x2c   : > { %1967 = vmatpush3.bf16.msra.mxu1 %v2170_v1  ;;  %s2783_s1 = sld [smem:[#allocation10_spill]]  ;;  %vm1641_vm4 = vcmask 523264   ;;  %vm1694_vm5 = vcmask 257024  }
  0x2d   : > { %s1913_s17 = sshll.u32 %s2481_s29, 3  ;;  %1968 = vmatprep.subr.bf16.mxu1 %v2330_v0 }
  0x30   : > { %s485_s27 = scalar_lea.vmem %s2782_s0, %s1913_s17  ;;  %1969 = vmatpush3.bf16.msra.mxu1 %v2171_v2  ;;  %s1914_s17 = sshll.u32 %s2481_s29, 4 }
  0x31   : > { %v2497_v3 = vld [vmem:[%s485_s27] sm:$0xff]   ;;  %1974 = vmatprep.subr.bf16.mxu1 %v2330_v0  ;;  %s2537_s28 = scalar_lea.vmem %s2763_s2, %s1914_s17  ;;  %s474_s27 = sand.u32 1, %s2309_s22  }
  0x32   : > { %s2510_s20 = scalar_lea.vmem %s2783_s1, %s1914_s17  ;;  %v576_v24 = vld [vmem:[%s2537_s28] sm:$0xf]  ;;  %v1858_v53 = vld [vmem:[%s2537_s28 + $0x4] sm:$0xf]  ;;  %s1835_s18 = sshll.u32 %s474_s27, 3 }
  0x33   : > { %1971 = vmatmul.mubr.msk.bf16.vlgmr.msra.gmra.mxu1 %vm529_vm1, %v2497_v3  ;;  %v575_v4 = vld [vmem:[%s2510_s20] sm:$0xf]  ;;  %v649_v26 = vsel %vm647_vm3, %v576_v24, 0  ;;  %v1857_v38 = vld [vmem:[%s2510_s20 + $0x4] sm:$0xf]  ;;  %v839_v54 = vsel %vm647_vm3, %v1858_v53, 0 }
  0x34   : > { %1976 = vmatprep.mubr.msk.bf16.mxu1 %vm2331_vm0, %v2330_v0  ;;  %v582_v5 = vsel %vm577_vm2, %v575_v4, 0  ;;  %1981 = vmatpush3.bf16.msra.mxu0 %v649_v26  ;;  %v773_v42 = vsel %vm577_vm2, %v1857_v38, 0  ;;  %s476_s19 = scalar_lea.vmem [#allocation5], %s1835_s18  ;;  %s2716_s30 = scalar_lea.sflag [#allocation4], %s474_s27 }
  0x35   : > { %1975 = vmatpush3.bf16.xpose.msra.mxu1 %v582_v5  ;;  %1994 = vmatprep.subr.bf16.mxu0 %v2330_v0 }
  0x36   : > { %1986 = vmatprep.subr.bf16.mxu1 %v2330_v0 }
  0xf3   : > { %v567_v6 = vpop.f32.mrf.mxu1 }
  0xf4   : > { %v568_v10 = vadd.f32 %v1842_v7, %v567_v6  ;;  %v697_v6 = vld [vmem:[%s2766_s5] sm:$0xf] }
  0xf5   : > { %v1972_v8 = vpop.f32.mrf.mxu1 }
  0xf6   : > { %v1861_v8 = vld [vmem:[%s2766_s5 + $0x4] sm:$0xf] }
  0xf7   : > { %v570_v9 = vpop.f32.mrf.mxu1 }
  0xf8   : > { %v571_v11 = vadd.f32 %v1842_v7, %v570_v9  ;;  %v940_v7 = vsel %vm647_vm3, %v697_v6, 0  ;;  %v893_v9 = vsel %vm647_vm3, %v1861_v8, 0  ;;  %v2178_v8 = vld [vmem:[%s2764_s3 + $0x30] sm:$0xff]  }
  0xf9   : > { %v1973_v12 = vpop.f32.mrf.mxu1 }
  0xfa   : > { %v574_v14 = vpack.c.bf16 %v571_v11, %v568_v10 }
  0xfc   : > { %1977 = vmatmul.mubr.msk.bf16.vlgmr.msra.gmra.mxu1 %vm577_vm2, %v574_v14 }
  0xfd   : > { %1987 = vmatpush3.bf16.msra.mxu1 %v2173_v13  ;;  %1990 = vmatprep.mubr.msk.bf16.mxu1 %vm2331_vm0, %v2330_v0 }
  0xfe   : > { %1988 = vmatprep.subr.bf16.mxu1 %v2330_v0 }
 0x101   : > { %1989 = vmatpush3.bf16.msra.mxu1 %v2174_v15 }
 0x102   : > { %2000 = vmatprep.subr.bf16.mxu1 %v2330_v0 }
 0x104   : > { %1991 = vmatmul.mubr.msk.bf16.vlgmr.msra.gmra.mxu1 %vm529_vm1, %v2497_v3 }
 0x105   : > { %2002 = vmatprep.mubr.msk.bf16.mxu1 %vm2331_vm0, %v2330_v0  ;;  %2001 = vmatpush3.bf16.msra.mxu1 %v839_v54 }
 0x106   : > { %2012 = vmatprep.subr.bf16.mxu1 %v2330_v0 }
 0x1bc   : > { %v618_v16 = vpop.f32.mrf.mxu1 }
 0x1bd   : > { %v625_v17 = vsel %vm577_vm2, %v618_v16, -inf }
 0x1be   : > { %626 = vmax.xlane.f32.xlu0 %v625_v17  ;;  %v1978_v18 = vpop.f32.mrf.mxu1 }
 0x1c0   : > { %v621_v19 = vpop.f32.mrf.mxu1 }
 0x1c1   : > { %v628_v20 = vsel %vm577_vm2, %v621_v19, -inf }
 0x1c2   : > { %629 = vmax.xlane.f32.xlu0 %v628_v20  ;;  %v1979_v21 = vpop.f32.mrf.mxu1 }
 0x1c4   : > { %v757_v23 = vpop.f32.mrf.mxu1 }
 0x1c5   : > { %v758_v27 = vadd.f32 %v1853_v22, %v757_v23 }
 0x1c6   : > { %v1992_v25 = vpop.f32.mrf.mxu1 }
 0x1c8   : > { %v760_v28 = vpop.f32.mrf.mxu1 }
 0x1c9   : > { %v761_v29 = vadd.f32 %v1853_v22, %v760_v28 }
 0x1ca   : > { %v1993_v30 = vpop.f32.mrf.mxu1 }
 0x1cb   : > { %v764_v31 = vpack.c.bf16 %v761_v29, %v758_v27  ;;  %v2175_v27 = vld [vmem:[%s2764_s3 + $0x28] sm:$0xff]   ;;  %v2176_v29 = vld [vmem:[%s2764_s3 + $0x20] sm:$0xff]  }
 0x1cc   : > { %v1872_v30 = vld [vmem:[%s2510_s20 + $0x8] sm:$0xf] }
 0x247   : > { %v627_v32 = vpop.xlane.xlu0 %626 }
 0x248   : > { %v631_v33 = vsub.f32 %v618_v16, %v627_v32 }
 0x24a   : > { %v633_v34 = vmul.f32 1.442695, %v631_v33 }
 0x24b   : > { %v630_v35 = vpop.xlane.xlu0 %629 }
 0x24c   : > { %v632_v36 = vsub.f32 %v621_v19, %v630_v35  ;;  %2187 = vpow2.f32 %v633_v34 }
 0x24e   : > { %v635_v37 = vmul.f32 1.442695, %v632_v36 }
 0x250   : > { %2189 = vpow2.f32 %v635_v37 }
 0x259   : > { %v2188_v39 = vpop.eup %2187 }
 0x25a   : > { %v637_v1 = vsel %vm577_vm2, %v2188_v39, 0.0 }
 0x25d   : > { %v2190_v40 = vpop.eup %2189 }
 0x25e   : > { %v643_v41 = vpack.c.bf16 %v2190_v40, %v2188_v39  ;;  %v640_v5 = vsel %vm577_vm2, %v2190_v40, 0.0 }
 0x260   : > { %1983 = vmatmul.mubr.msk.bf16.vlgmr.msra.gmra.mxu0 %vm577_vm2, %v643_v41 }
 0x261   : > { %1995 = vmatpush3.bf16.xpose.msra.mxu0 %v773_v42  ;;  %1996 = vmatprep.mubr.msk.bf16.mxu0 %vm2331_vm0, %v2330_v0 }
 0x262   : > { %2006 = vmatprep.subr.bf16.mxu0 %v2330_v0 }
 0x268   : > { %1997 = vmatmul.mubr.msk.bf16.vlgmr.msra.gmra.mxu0 %vm577_vm2, %v764_v31  ;;  %v1058_v31 = vsel %vm577_vm2, %v1872_v30, 0 }
 0x269   : > { %2008 = vmatprep.mubr.msk.bf16.mxu0 %vm2331_vm0, %v2330_v0  ;;  %2007 = vmatpush3.bf16.msra.mxu0 %v893_v9  ;;  %v1876_v9 = vld [vmem:[%s2766_s5 + $0x8] sm:$0xf] }
 0x26a   : > { %2018 = vmatprep.subr.bf16.mxu0 %v2330_v0 }
 0x320   : > { %v685_v43 = vpop.f32.mrf.mxu0 }
 0x322   : > { %v1984_v44 = vpop.f32.mrf.mxu0 }
 0x324   : > { %v688_v45 = vpop.f32.mrf.mxu0 }
 0x326   : > { %v1985_v46 = vpop.f32.mrf.mxu0 }
 0x328   : > { %v809_v47 = vpop.f32.mrf.mxu0 }
 0x329   : > { %v816_v48 = vsel %vm577_vm2, %v809_v47, -inf }
 0x32a   : > { %817 = vmax.xlane.f32.xlu1 %v816_v48  ;;  %v1998_v49 = vpop.f32.mrf.mxu0 }
 0x32c   : > { %v812_v50 = vpop.f32.mrf.mxu0 }
 0x32d   : > { %v819_v51 = vsel %vm577_vm2, %v812_v50, -inf }
 0x32e   : > { %820 = vmax.xlane.f32.xlu1 %v819_v51  ;;  %v1999_v52 = vpop.f32.mrf.mxu0 }
 0x3b3   : > { %v818_v55 = vpop.xlane.xlu1 %817 }
 0x3b4   : > { %v822_v56 = vsub.f32 %v809_v47, %v818_v55 }
 0x3b6   : > { %v824_v57 = vmul.f32 1.442695, %v822_v56  ;;  %v1873_v56 = vld [vmem:[%s2537_s28 + $0x8] sm:$0xf] }
 0x3b7   : > { %v821_v58 = vpop.xlane.xlu1 %820 }
 0x3b8   : > { %2191 = vpow2.f32 %v824_v57  ;;  %v823_v59 = vsub.f32 %v812_v50, %v821_v58  ;;  %v1124_v57 = vsel %vm647_vm3, %v1873_v56, 0 }
 0x3ba   : > { %v826_v60 = vmul.f32 1.442695, %v823_v59 }
 0x3bc   : > { %2193 = vpow2.f32 %v826_v60 }
 0x3c5   : > { %v2192_v61 = vpop.eup %2191 }
 0x3c6   : > { %v828_v62 = vsel %vm577_vm2, %v2192_v61, 0.0 }
 0x3c7   : > { %829 = vadd.xlane.f32.xlu0 %v828_v62 }
 0x3c9   : > { %v2194_v63 = vpop.eup %2193 }
 0x3ca   : > { %v831_v2 = vsel %vm577_vm2, %v2194_v63, 0.0  ;;  %v834_v4 = vpack.c.bf16 %v2194_v63, %v2192_v61 }
 0x3cb   : > { %638 = vadd.xlane.f32.xlu0 %v637_v1  ;;  %832 = vadd.xlane.f32.xlu1 %v831_v2 }
 0x3cc   : > { %2003 = vmatmul.mubr.msk.bf16.vlgmr.msra.gmra.mxu1 %vm577_vm2, %v834_v4 }
 0x3cd   : > { %2014 = vmatprep.mubr.msk.bf16.mxu1 %vm2331_vm0, %v2330_v0  ;;  %2013 = vmatpush3.bf16.msra.mxu1 %v940_v7 }
 0x3ce   : > { %2026 = vmatprep.subr.bf16.mxu1 %v2330_v0 }
 0x3cf   : > { %641 = vadd.xlane.f32.xlu1 %v640_v5  ;;  %v2177_v5 = vld [vmem:[%s2764_s3 + $0x38] sm:$0xff]  }
 0x450   : > { %v830_v10 = vpop.xlane.xlu0 %829 }
 0x454   : > { %v639_v11 = vpop.xlane.xlu0 %638  ;;  %v833_v12 = vpop.xlane.xlu1 %832 }
 0x455   : > { %2195 = vrcp.f32 %v639_v11 }
 0x458   : > { %v642_v13 = vpop.xlane.xlu1 %641 }
 0x459   : > { %2197 = vrcp.f32 %v642_v13 }
 0x45a   : > { %2199 = vrcp.f32 %v830_v10  ;;  %v1178_v10 = vsel %vm647_vm3, %v1876_v9, 0  ;;  %v2180_v9 = vld [vmem:[%s2768_s7] sm:$0xff]  }
 0x45b   : > { %2201 = vrcp.f32 %v833_v12 }
 0x462   : > { %v2196_v14 = vpop.eup %2195 }
 0x463   : > { %v694_v16 = vmul.f32 %v2196_v14, %v685_v43  ;;  %v1868_v43 = vld [vmem:[#allocation2 + $0x2] ss:$0 sm:$0xff] }
 0x466   : > { %v2198_v15 = vpop.eup %2197 }
 0x467   : > { %v695_v17 = vmul.f32 %v2198_v15, %v688_v45  ;;  %v2200_v21 = vpop.eup %2199 }
 0x468   : > { %v2202_v22 = vpop.eup %2201 }
 0x469   : > { %v696_v18 = vpack.c.bf16 %v695_v17, %v694_v16 }
 0x46b   : > { %2015 = vmatmul.mubr.msk.bf16.vlgmr.msra.gmra.mxu1 %vm577_vm2, %v696_v18  ;;  %v1886_v18 = vld [vmem:[%s2510_s20 + $0xc] sm:$0xf]  ;;  %s1713_s20 = sshll.u32 %s476_s19, 4  ;;  %s2714_s20 = int_to_ptr.vmem [resolvable:$true] %s1713_s20 }
 0x46c   : > { %2028 = vmatprep.mubr.msk.bf16.mxu1 %vm2331_vm0, %v2330_v0  ;;  %2027 = vmatpush3.bf16.xpose.msra.mxu1 %v1058_v31  ;;  %s2245_s14 = scalar_lea.vmem %s2714_s20, 128 }
 0x46d   : > { %2038 = vmatprep.subr.bf16.mxu1 %v2330_v0  ;;  %p2246_p10 = scmp.ne.s32.totalorder %s2714_s20, %s2245_s14 }
 0x46f   : > { %p2247_p11 = pnand %p2246_p10, %p2440_p4 }
 0x471   : > { %p2248_p13 = pneg %p2247_p11 }
 0x48c   : > { %v875_v19 = vpop.f32.mrf.mxu1 }
 0x48d   : > { %v884_v24 = vmul.f32 %v2200_v21, %v875_v19 }
 0x48e   : > { %v2004_v20 = vpop.f32.mrf.mxu1 }
 0x490   : > { %v878_v23 = vpop.f32.mrf.mxu1 }
 0x491   : > { %v885_v25 = vmul.f32 %v2202_v22, %v878_v23  ;;  %v1298_v23 = vsel %vm577_vm2, %v1886_v18, 0 }
 0x492   : > { %v2005_v26 = vpop.f32.mrf.mxu1 }
 0x493   : > { %v886_v28 = vpack.c.bf16 %v885_v25, %v884_v24  ;;  %v1882_v25 = vld [vmem:[#allocation2 + $0x3] ss:$0 sm:$0xff] }
 0x495   : > { %2009 = vmatmul.mubr.msk.bf16.vlgmr.msra.gmra.mxu0 %vm577_vm2, %v886_v28 }
 0x496   : > { %2019 = vmatpush3.bf16.msra.mxu0 %v2175_v27  ;;  %2022 = vmatprep.mubr.msk.bf16.mxu0 %vm2331_vm0, %v2330_v0 }
 0x497   : > { %2020 = vmatprep.subr.bf16.mxu0 %v2330_v0 }
 0x49a   : > { %2021 = vmatpush3.bf16.msra.mxu0 %v2176_v29 }
 0x49b   : > { %2032 = vmatprep.subr.bf16.mxu0 %v2330_v0 }
 0x49d   : > { %2023 = vmatmul.mubr.msk.bf16.vlgmr.msra.gmra.mxu0 %vm529_vm1, %v2497_v3 }
 0x49e   : > { %2034 = vmatprep.mubr.msk.bf16.mxu0 %vm2331_vm0, %v2330_v0  ;;  %2033 = vmatpush3.bf16.msra.mxu0 %v1124_v57  ;;  %v1890_v57 = vld [vmem:[%s2766_s5 + $0xc] sm:$0xf] }
 0x49f   : > { %2044 = vmatprep.subr.bf16.mxu0 %v2330_v0 }
 0x52b   : > { %v976_v32 = vpop.f32.mrf.mxu1 }
 0x52d   : > { %v2016_v33 = vpop.f32.mrf.mxu1 }
 0x52f   : > { %v979_v34 = vpop.f32.mrf.mxu1 }
 0x531   : > { %v2017_v35 = vpop.f32.mrf.mxu1 }
 0x555   : > { %v929_v36 = vpop.f32.mrf.mxu0 }
 0x556   : > { %v2594_v37 = vadd.f32 %v976_v32, %v929_v36 }
 0x557   : > { %v2010_v38 = vpop.f32.mrf.mxu0 }
 0x559   : > { %v932_v39 = vpop.f32.mrf.mxu0 }
 0x55a   : > { %v2596_v40 = vadd.f32 %v979_v34, %v932_v39 }
 0x55b   : > { %v2011_v41 = vpop.f32.mrf.mxu0 }
 0x55d   : > { %v1042_v42 = vpop.f32.mrf.mxu0 }
 0x55e   : > { %v1043_v46 = vadd.f32 %v1868_v43, %v1042_v42 }
 0x55f   : > { %v2024_v44 = vpop.f32.mrf.mxu0 }
 0x561   : > { %v1045_v45 = vpop.f32.mrf.mxu0 }
 0x562   : > { %v1046_v47 = vadd.f32 %v1868_v43, %v1045_v45 }
 0x563   : > { %v2025_v48 = vpop.f32.mrf.mxu0 }
 0x564   : > { %v1049_v49 = vpack.c.bf16 %v1046_v47, %v1043_v46  ;;  %v1887_v46 = vld [vmem:[%s2537_s28 + $0xc] sm:$0xf]  ;;  %s1918_s28 = sshll.u32 %s2317_s24, 7  ;;  %s2332_s24 = smov [#allocation5]  }
 0x565   : > { %s2712_s0 = scalar_lea.hbm %s2773_s12, %s1918_s28  ;;  %s2249_s18 = sshll.u32 %s2332_s24, 4  ;;  %s2250_s18 = int_to_ptr.vmem [resolvable:$false] %s2249_s18 }
 0x566   : > { %2029 = vmatmul.mubr.msk.bf16.vlgmr.msra.gmra.mxu1 %vm577_vm2, %v1049_v49  ;;  %s2251_s29 = scalar_lea.vmem %s2250_s18, 256  ;;  %p2252_p0 = scmp.lt.s32.totalorder %s2714_s20, %s2250_s18 }
 0x567   : > { %2040 = vmatprep.mubr.msk.bf16.mxu1 %vm2331_vm0, %v2330_v0  ;;  %2039 = vmatpush3.bf16.msra.mxu1 %v1178_v10  ;;  %v2181_v10 = vld [vmem:[%s2769_s8 + $0x8] sm:$0xff]   ;;  %p2253_p1 = scmp.lt.s32.totalorder %s2251_s29, %s2245_s14 }
 0x568   : > { %2052 = vmatprep.subr.bf16.mxu1 %v2330_v0 }
 0x569   : > { %p2254_p2 = por %p2253_p1, %p2252_p0 }
 0x56b   : > { %p2255_p3 = pnand %p2254_p2, %p2248_p13 }
 0x626   : > { %v1094_v50 = vpop.f32.mrf.mxu1 }
 0x627   : > { %v1101_v51 = vsel %vm577_vm2, %v1094_v50, -inf }
 0x628   : > { %1102 = vmax.xlane.f32.xlu0 %v1101_v51  ;;  %v2030_v52 = vpop.f32.mrf.mxu1 }
 0x62a   : > { %v1097_v53 = vpop.f32.mrf.mxu1 }
 0x62b   : > { %v1104_v54 = vsel %vm577_vm2, %v1097_v53, -inf }
 0x62c   : > { %1105 = vmax.xlane.f32.xlu1 %v1104_v54  ;;  %v2031_v55 = vpop.f32.mrf.mxu1 }
 0x6b1   : > { %v1103_v58 = vpop.xlane.xlu0 %1102 }
 0x6b2   : > { %v1107_v59 = vsub.f32 %v1094_v50, %v1103_v58  ;;  %v1418_v58 = vsel %vm647_vm3, %v1890_v57, 0 }
 0x6b4   : > { %v1109_v60 = vmul.f32 1.442695, %v1107_v59 }
 0x6b5   : > { %v1106_v61 = vpop.xlane.xlu1 %1105 }
 0x6b6   : > { %2203 = vpow2.f32 %v1109_v60  ;;  %v1108_v62 = vsub.f32 %v1097_v53, %v1106_v61 }
 0x6b8   : > { %v1111_v63 = vmul.f32 1.442695, %v1108_v62 }
 0x6ba   : > { %2205 = vpow2.f32 %v1111_v63 }
 0x6c3   : > { %v2204_v1 = vpop.eup %2203 }
 0x6c4   : > { %v1113_v2 = vsel %vm577_vm2, %v2204_v1, 0.0 }
 0x6c5   : > { %1114 = vadd.xlane.f32.xlu0 %v1113_v2 }
 0x6c7   : > { %v2206_v4 = vpop.eup %2205 }
 0x6c8   : > { %v1116_v6 = vsel %vm577_vm2, %v2206_v4, 0.0  ;;  %v1119_v7 = vpack.c.bf16 %v2206_v4, %v2204_v1 }
 0x6c9   : > { %1117 = vadd.xlane.f32.xlu1 %v1116_v6 }
 0x6ca   : > { %2035 = vmatmul.mubr.msk.bf16.vlgmr.msra.gmra.mxu0 %vm577_vm2, %v1119_v7  ;;  %v2179_v7 = vld [vmem:[%s2768_s7 + $0x8] sm:$0xff]  }
 0x6cb   : > { %2045 = vmatpush3.bf16.msra.mxu0 %v2177_v5  ;;  %2048 = vmatprep.mubr.msk.bf16.mxu0 %vm2331_vm0, %v2330_v0 }
 0x6cc   : > { %2046 = vmatprep.subr.bf16.mxu0 %v2330_v0 }
 0x6cf   : > { %2047 = vmatpush3.bf16.msra.mxu0 %v2178_v8 }
 0x6d0   : > { %2058 = vmatprep.subr.bf16.mxu0 %v2330_v0 }
 0x6d2   : > { %2049 = vmatmul.mubr.msk.bf16.vlgmr.msra.gmra.mxu0 %vm529_vm1, %v2497_v3 }
 0x6d3   : > { %2060 = vmatprep.mubr.msk.bf16.mxu0 %vm2331_vm0, %v2330_v0 }
 0x74e   : > { %v1115_v11 = vpop.xlane.xlu0 %1114 }
 0x74f   : > { %2207 = vrcp.f32 %v1115_v11  ;;  %v2182_v11 = vld [vmem:[%s2769_s8] sm:$0xff]  }
 0x752   : > { %v1118_v12 = vpop.xlane.xlu1 %1117 }
 0x753   : > { %2209 = vrcp.f32 %v1118_v12 }
 0x75c   : > { %v2208_v15 = vpop.eup %2207 }
 0x760   : > { %v2210_v16 = vpop.eup %2209 }
 0x78a   : > { %v1160_v13 = vpop.f32.mrf.mxu0 }
 0x78b   : > { %v1169_v19 = vmul.f32 %v2208_v15, %v1160_v13  ;;  %v1892_v15 = vld [vmem:[%s2767_s6] ss:$0 sm:$0xff] }
 0x78c   : > { %v2036_v14 = vpop.f32.mrf.mxu0 }
 0x78e   : > { %v1163_v17 = vpop.f32.mrf.mxu0 }
 0x78f   : > { %v1170_v20 = vmul.f32 %v2210_v16, %v1163_v17 }
 0x790   : > { %v2037_v21 = vpop.f32.mrf.mxu0 }
 0x791   : > { %v1171_v22 = vpack.c.bf16 %v1170_v20, %v1169_v19  ;;  %v2183_v20 = vld [vmem:[%s2771_s10 + $0x18] sm:$0xff]  }
 0x792   : > { %v1282_v24 = vpop.f32.mrf.mxu0 }
 0x793   : > { %2041 = vmatmul.mubr.msk.bf16.vlgmr.msra.gmra.mxu1 %vm577_vm2, %v1171_v22  ;;  %v1283_v28 = vadd.f32 %v1882_v25, %v1282_v24 }
 0x794   : > { %2053 = vmatpush3.bf16.xpose.msra.mxu1 %v1298_v23  ;;  %v2050_v26 = vpop.f32.mrf.mxu0  ;;  %2054 = vmatprep.mubr.msk.bf16.mxu1 %vm2331_vm0, %v2330_v0 }
 0x795   : > { %2064 = vmatprep.subr.bf16.mxu1 %v2330_v0  ;;  %v2184_v26 = vld [vmem:[%s2771_s10 + $0x10] sm:$0xff]  }
 0x796   : > { %v1285_v27 = vpop.f32.mrf.mxu0 }
 0x797   : > { %v1286_v29 = vadd.f32 %v1882_v25, %v1285_v27  ;;  %v2185_v27 = vld [vmem:[%s2771_s10 + $0x8] sm:$0xff]  }
 0x798   : > { %v2051_v30 = vpop.f32.mrf.mxu0 }
 0x799   : > { %v1289_v31 = vpack.c.bf16 %v1286_v29, %v1283_v28  ;;  %v2186_v28 = vld [vmem:[%s2771_s10] sm:$0xff]  }
 0x79b   : > { %2055 = vmatmul.mubr.msk.bf16.vlgmr.msra.gmra.mxu1 %vm577_vm2, %v1289_v31  ;;  %v1899_v31 = vld [vmem:[%s2770_s9] ss:$0 sm:$0xff] }
 0x79c   : > { %2066 = vmatprep.mubr.msk.bf16.mxu1 %vm2331_vm0, %v2330_v0  ;;  %2065 = vmatpush3.bf16.msra.mxu1 %v1418_v58 }
 0x79d   : > { %2078 = vmatprep.subr.bf16.mxu1 %v2330_v0 }
 0x853   : > { %v1214_v32 = vpop.f32.mrf.mxu1 }
 0x854   : > { %v2638_v33 = vadd.f32 %v1214_v32, %v2594_v37  ;;  %v1364_v37 = vsel %vm647_vm3, %v1887_v46, 0 }
 0x855   : > { %v2042_v34 = vpop.f32.mrf.mxu1  ;;  %2059 = vmatpush3.bf16.msra.mxu0 %v1364_v37 }
 0x856   : > { %2070 = vmatprep.subr.bf16.mxu0 %v2330_v0 }
 0x857   : > { %v1217_v35 = vpop.f32.mrf.mxu1 }
 0x858   : > { %v2641_v36 = vadd.f32 %v1217_v35, %v2596_v40 }
 0x859   : > { %v2043_v38 = vpop.f32.mrf.mxu1 }
 0x85b   : > { %v1334_v39 = vpop.f32.mrf.mxu1 }
 0x85c   : > { %v1341_v41 = vsel %vm577_vm2, %v1334_v39, -inf }
 0x85d   : > { %1342 = vmax.xlane.f32.xlu0 %v1341_v41  ;;  %v2056_v42 = vpop.f32.mrf.mxu1 }
 0x85e   : > { %v1900_v42 = vld [vmem:[%s2772_s11] ss:$0 sm:$0xff] }
 0x85f   : > { %v1337_v43 = vpop.f32.mrf.mxu1 }
 0x860   : > { %v1344_v44 = vsel %vm577_vm2, %v1337_v43, -inf }
 0x861   : > { %1345 = vmax.xlane.f32.xlu1 %v1344_v44  ;;  %v2057_v45 = vpop.f32.mrf.mxu1 }
 0x8e6   : > { %v1343_v47 = vpop.xlane.xlu0 %1342 }
 0x8e7   : > { %v1347_v40 = vsub.f32 %v1334_v39, %v1343_v47 }
 0x8e9   : > { %v1349_v48 = vmul.f32 1.442695, %v1347_v40 }
 0x8ea   : > { %v1346_v49 = vpop.xlane.xlu1 %1345 }
 0x8eb   : > { %2211 = vpow2.f32 %v1349_v48  ;;  %v1348_v50 = vsub.f32 %v1337_v43, %v1346_v49 }
 0x8ed   : > { %v1351_v51 = vmul.f32 1.442695, %v1348_v50 }
 0x8ef   : > { %2213 = vpow2.f32 %v1351_v51 }
 0x8f8   : > { %v2212_v52 = vpop.eup %2211 }
 0x8f9   : > { %v1353_v53 = vsel %vm577_vm2, %v2212_v52, 0.0 }
 0x8fa   : > { %1354 = vadd.xlane.f32.xlu0 %v1353_v53 }
 0x8fc   : > { %v2214_v54 = vpop.eup %2213 }
 0x8fd   : > { %v1356_v55 = vsel %vm577_vm2, %v2214_v54, 0.0  ;;  %v1359_v56 = vpack.c.bf16 %v2214_v54, %v2212_v52 }
 0x8fe   : > { %1357 = vadd.xlane.f32.xlu1 %v1356_v55 }
 0x8ff   : > { %2061 = vmatmul.mubr.msk.bf16.vlgmr.msra.gmra.mxu0 %vm577_vm2, %v1359_v56 }
 0x900   : > { %2074 = vmatprep.mubr.msk.bf16.mxu0 %vm2331_vm0, %v2330_v0  ;;  %2071 = vmatpush3.bf16.msra.mxu0 %v2181_v10 }
 0x901   : > { %2072 = vmatprep.subr.bf16.mxu0 %v2330_v0 }
 0x904   : > { %2073 = vmatpush3.bf16.msra.mxu0 %v2182_v11 }
 0x905   : > { %2086 = vmatprep.subr.bf16.mxu0 %v2330_v0 }
 0x983   : > { %v1355_v59 = vpop.xlane.xlu0 %1354 }
 0x984   : > { %2215 = vrcp.f32 %v1355_v59 }
 0x987   : > { %v1358_v60 = vpop.xlane.xlu1 %1357 }
 0x988   : > { %2217 = vrcp.f32 %v1358_v60 }
 0x991   : > { %v2216_v63 = vpop.eup %2215 }
 0x995   : > { %v2218_v1 = vpop.eup %2217 }
 0x9bf   : > { %v1400_v61 = vpop.f32.mrf.mxu0 }
 0x9c0   : > { %v1409_v4 = vmul.f32 %v2216_v63, %v1400_v61 }
 0x9c1   : > { %v2062_v62 = vpop.f32.mrf.mxu0 }
 0x9c3   : > { %v1403_v2 = vpop.f32.mrf.mxu0 }
 0x9c4   : > { %v1410_v5 = vmul.f32 %v2218_v1, %v1403_v2 }
 0x9c5   : > { %v2063_v6 = vpop.f32.mrf.mxu0 }
 0x9c6   : > { %v1411_v8 = vpack.c.bf16 %v1410_v5, %v1409_v4 }
 0x9c8   : > { %2067 = vmatmul.mubr.msk.bf16.vlgmr.msra.gmra.mxu1 %vm577_vm2, %v1411_v8 }
 0x9c9   : > { %2079 = vmatpush3.bf16.msra.mxu1 %v2179_v7  ;;  %2082 = vmatprep.mubr.msk.bf16.mxu1 %vm2331_vm0, %v2330_v0 }
 0x9ca   : > { %2080 = vmatprep.subr.bf16.mxu1 %v2330_v0 }
 0x9cd   : > { %2081 = vmatpush3.bf16.msra.mxu1 %v2180_v9 }
 0x9d0   : > { %2083 = vmatmul.mubr.msk.bf16.vlgmr.msra.gmra.mxu1 %vm529_vm1, %v2497_v3 }
 0xa88   : > { %v1454_v12 = vpop.f32.mrf.mxu1 }
 0xa89   : > { %v1461_v14 = vadd.f32 %v1454_v12, %v2638_v33 }
 0xa8a   : > { %v2068_v13 = vpop.f32.mrf.mxu1 }
 0xa8b   : > { %v1470_v18 = vadd.f32 %v1892_v15, %v1461_v14 }
 0xa8c   : > { %v1457_v16 = vpop.f32.mrf.mxu1 }
 0xa8d   : > { %v1462_v3 = vadd.f32 %v1457_v16, %v2641_v36 }
 0xa8e   : > { %v2069_v17 = vpop.f32.mrf.mxu1 }
 0xa8f   : > { %v1471_v19 = vadd.f32 %v1892_v15, %v1462_v3 }
 0xa90   : > { %v1583_v22 = vpop.f32.mrf.mxu1 }
 0xa91   : > { %v1476_v21 = vpack.c.bf16 %v1471_v19, %v1470_v18 }
 0xa92   : > { %v2084_v23 = vpop.f32.mrf.mxu1 }
 0xa93   : > { %2075 = vmatmul.mubr.msk.bf16.vlgmr.msra.gmra.mxu0 %vm529_vm1, %v1476_v21 }
 0xa94   : > { %2087 = vmatpush3.bf16.msra.mxu0 %v2183_v20  ;;  %2094 = vmatprep.mubr.msk.bf16.mxu0 %vm2331_vm0, %v2330_v0  ;;  %v1586_v24 = vpop.f32.mrf.mxu1 }
 0xa95   : > { %2088 = vmatprep.subr.bf16.mxu0 %v2330_v0 }
 0xa96   : > { %v2085_v25 = vpop.f32.mrf.mxu1 }
 0xa98   : > { %2089 = vmatpush3.bf16.msra.mxu0 %v2184_v26 }
 0xa99   : > { %2090 = vmatprep.subr.bf16.mxu0 %v2330_v0 }
 0xa9c   : > { %2091 = vmatpush3.bf16.msra.mxu0 %v2185_v27 }
 0xa9d   : > { %2092 = vmatprep.subr.bf16.mxu0 %v2330_v0 }
 0xaa0   : > { %2093 = vmatpush3.bf16.msra.mxu0 %v2186_v28 }
 0xb53   : > { %v1530_v29 = vpop.f32.mrf.mxu0 }
 0xb54   : > { %v1584_v30 = vadd.f32 %v1583_v22, %v1530_v29 }
 0xb55   : > { %v2076_v32 = vpop.f32.mrf.mxu0 }
 0xb56   : > { %v1597_v34 = vadd.f32 %v1899_v31, %v1584_v30 }
 0xb57   : > { %v1533_v33 = vpop.f32.mrf.mxu0 }
 0xb58   : > { %v1587_v35 = vadd.f32 %v1586_v24, %v1533_v33  ;;  %v1599_v0 = vmax.f32 %v1597_v34, 0.0 }
 0xb59   : > { %v2077_v36 = vpop.f32.mrf.mxu0 }
 0xb5a   : > { %v1598_v38 = vadd.f32 %v1899_v31, %v1587_v35 }
 0xb5c   : > { %v1600_v39 = vmax.f32 %v1598_v38, 0.0 }
 0xb5e   : > { %v1601_v41 = vpack.c.bf16 %v1600_v39, %v1599_v0 }
 0xb60   : > { %2095 = vmatmul.mubr.msk.bf16.vlgmr.msra.gmra.mxu0 %vm1641_vm4, %v1601_v41 }
 0xc20   : > { %v1679_v43 = vpop.f32.mrf.mxu0 }
 0xc21   : > { %v1680_v44 = vadd.f32 %v1900_v42, %v1679_v43 }
 0xc22   : > { %v2096_v45 = vpop.f32.mrf.mxu0 }
 0xc23   : > { %v1916_v46 = vpack.c.bf16 %v1680_v44, %v1680_v44 }
 0xc24   : > { %v1682_v37 = vpop.f32.mrf.mxu0 }
 0xc25   : > { %1695 = vst.msk [vmem:[%s476_s19] sm:$0xf] %vm1694_vm5, %v1916_v46  ;;  %v1683_v47 = vadd.f32 %v1900_v42, %v1682_v37 }
 0xc26   : > { %v2097_v40 = vpop.f32.mrf.mxu0 }
 0xc27   : > { %v1917_v48 = vpack.c.bf16 %v1683_v47, %v1683_v47 }
 0xc29   : > { %1696 = vst.msk [vmem:[%s476_s19 + $0x4] sm:$0xf] %vm1694_vm5, %v1917_v48 }
 0xc2a   : > { %2258 = shalt.err (!%p2255_p3)
}
 0xc2b   : > { %s2259_s27 = scalar_lea.hbm %s2712_s0, 128  ;;  %s2263_s17 = scalar_lea.hbm %s2773_s12, 256 }
 0xc2c   : > { %p2260_p5 = scmp.ne.s32.totalorder %s2712_s0, %s2259_s27  ;;  %p2264_p9 = scmp.lt.s32.totalorder %s2712_s0, %s2773_s12 }
 0xc2d   : > { %p2265_p12 = scmp.lt.s32.totalorder %s2263_s17, %s2259_s27 }
 0xc2e   : > { %p2261_p6 = pnand %p2260_p5, %p2440_p4 }
 0xc2f   : > { %p2266_p10 = por %p2265_p12, %p2264_p9 }
 0xc30   : > { %p2262_p7 = pneg %p2261_p6 }
 0xc32   : > { %p2267_p11 = pnand %p2266_p10, %p2262_p7 }
 0xc34   : > { %2270 = shalt.err (!%p2267_p11)
}
 0xc35   : > { %s2333_s14 = smov 64   ;;  %s2334_s18 = smov 4  }
 0xc36   : > { %2102 = dma.vmem_to_hbm [thread:$0]  (%p2440_p4), %s2714_s20, 128, %s2712_s0, %s2716_s30, %s2333_s14, %s2333_s14, %s2334_s18  }
 0xc37 PF: > { %p2114_p13 = scmp.ge.s32.totalorder %s2325_s26, 2  ;;  %s1728_s29 = sand.u32 1, %s2305_s21  }
 0xc38   : > { %s1729_s1 = scalar_lea.sflag [#allocation4], %s1728_s29 }
 0xc39   : > { %p2109_p0 = pnand %p2114_p13, %p2447_p8 }
 0xc3b   : > { %p2110_p1 = pneg %p2109_p0 }
 0xc3d   : > { %2300 = dma.done.wait (%p2110_p1), %s1729_s1, 128  }
 0xc3e   : > { %2302 = vsyncadd (%p2110_p1), %s1729_s1, 4294967168  ;;  %s26_s26 = sadd.s32 1, %s2325_s26   ;;  %s2784_s0 = sld [smem:[#allocation8_spill]] }
 0xc3f   : > { %p23_p2 = scmp.ge.s32.totalorder %s26_s26, 4   ;;  %s2785_s21 = smov %s2309_s22 }
 0xc40   : > { %s2786_s22 = smov %s2313_s23  ;;  %s2787_s23 = smov %s2453_s16 }
 0xc41   : > { %s2788_s24 = smov %s2321_s25  ;;  %25 = sbr.rel (!%p23_p2) target bundleno = 8 (0x8), region = 129 }
 0xc44   : > { %s2789_s25 = smov %s2784_s0 }
 0xc46   :  { %1734 = vsyncpa [#allocation3], 1 }
 0xc47   :  { %1736 = vsyncpa [#allocation3 + $0x1], 1 }
 0xc48   :  { %1737 = vsyncpa [#allocation4], 1 }
 0xc49   :  { %1739 = vsyncpa [#allocation4 + $0x1], 1 }

</bundles_post_ra>
